<compile_context>
chip_gen: v7x
topology: tpu7x:2x2x1
jax: 0.10.0
libtpu: 0.0.40
codegen_flags: <defaults>
</compile_context>

<pallas_src>
import functools

import jax
import jax.numpy as jnp
from jax import lax
from jax.experimental import pallas as pl
from jax.experimental.pallas import tpu as pltpu


def _diffuser_output_kernel(x_ref, w_ref, b_ref, res_ref, gamma_ref, beta_ref,
                            o_ref, *, eps):
    # x_ref:     (tm, I)   tile of hidden_states (intermediate activations)
    # w_ref:     (I,  H)   dense weight (in x out layout), grid-invariant
    # b_ref:     (1,  H)   dense bias   (f32, pre-cast in wrapper)
    # res_ref:   (tm, H)   tile of input_tensor (residual)
    # gamma_ref: (1,  H)   LayerNorm weight (f32)
    # beta_ref:  (1,  H)   LayerNorm bias   (f32)
    # o_ref:     (tm, H)   output tile

    # Dense on the MXU: keep operands in their native dtype (bf16 operands get
    # full MXU throughput on v6e/v7x), accumulate in f32.
    h = jnp.dot(x_ref[...], w_ref[...], preferred_element_type=jnp.float32)

    # TODO(synk): dropout is identity in eval mode (p only applies in training);
    # intentionally omitted here.

    # Bias + residual (f32 math).
    h = h + b_ref[...] + res_ref[...].astype(jnp.float32)

    # LayerNorm over the hidden axis, single-pass moments.
    mean = jnp.mean(h, axis=-1, keepdims=True)
    meansq = jnp.mean(h * h, axis=-1, keepdims=True)
    var = jnp.maximum(meansq - mean * mean, 0.0)
    inv = lax.rsqrt(var + eps)
    y = (h - mean) * inv * gamma_ref[...] + beta_ref[...]

    o_ref[...] = y.astype(o_ref.dtype)


def _choose_row_tile(rows, requested):
    if rows <= requested:
        # Single tile covering all rows; a full-extent block is always legal.
        return rows
    # Multiple tiles: keep sublane (8) alignment; last tile may be partial.
    return max(8, (requested // 8) * 8)


def diffuser_output(hidden_states, input_tensor, w, b, gamma, beta,
                    *, eps=1e-12, row_tile=256):
    """Fused dense + residual-add + LayerNorm (eval-mode dropout = identity).

    hidden_states: (B, S, intermediate_size)
    input_tensor:  (B, S, hidden_size)
    w:             (intermediate_size, hidden_size)   (nn.Linear.weight.T)
    b, gamma, beta:(hidden_size,)
    returns:       (B, S, hidden_size)   same dtype as hidden_states
    """
    B, S, I = hidden_states.shape
    H = input_tensor.shape[-1]
    rows = B * S

    tm = _choose_row_tile(rows, row_tile)
    grid = (pl.cdiv(rows, tm),)

    x2 = hidden_states.reshape(rows, I)
    r2 = input_tensor.reshape(rows, H)
    # Grid-invariant params cast to f32 once here (hoisted out of the kernel).
    b2 = b.astype(jnp.float32).reshape(1, H)
    g2 = gamma.astype(jnp.float32).reshape(1, H)
    be2 = beta.astype(jnp.float32).reshape(1, H)

    x_bytes = jnp.dtype(x2.dtype).itemsize
    r_bytes = jnp.dtype(r2.dtype).itemsize
    w_bytes = jnp.dtype(w.dtype).itemsize
    o_bytes = jnp.dtype(hidden_states.dtype).itemsize

    # Advisory cost for XLA's scheduler around the custom call.
    cost = pl.CostEstimate(
        flops=2 * rows * I * H,
        transcendentals=0,
        bytes_accessed=(rows * I * x_bytes + I * H * w_bytes
                        + rows * H * r_bytes + rows * H * o_bytes
                        + 3 * H * 4),
    )

    # VMEM plan: double-buffered x / residual / out tiles + resident weight
    # (Pallas only DMAs the grid-invariant weight once). Cap at 64 MiB so the
    # same plan fits v7x physical VMEM.
    # TODO(synk): for very large intermediate_size on v7x, add a K grid axis
    # with an f32 accumulator (or pipeline_mode=pl.Buffered(1) on the weight)
    # instead of holding the full weight resident.
    vmem_est = (2 * (tm * I * x_bytes + tm * H * r_bytes + tm * H * o_bytes)
                + 2 * I * H * w_bytes + 6 * H * 4)
    vmem_limit = int(min(max(vmem_est + vmem_est // 4, 32 * 1024 * 1024),
                         64 * 1024 * 1024))

    kernel = functools.partial(_diffuser_output_kernel, eps=eps)

    out2 = pl.pallas_call(
        kernel,
        out_shape=jax.ShapeDtypeStruct((rows, H), hidden_states.dtype),
        grid_spec=pltpu.PrefetchScalarGridSpec(
            num_scalar_prefetch=0,
            grid=grid,
            in_specs=[
                pl.BlockSpec((tm, I), lambda i: (i, 0)),   # x tile
                pl.BlockSpec((I, H), lambda i: (0, 0)),    # weight (resident)
                pl.BlockSpec((1, H), lambda i: (0, 0)),    # bias (f32)
                pl.BlockSpec((tm, H), lambda i: (i, 0)),   # residual tile
                pl.BlockSpec((1, H), lambda i: (0, 0)),    # ln gamma (f32)
                pl.BlockSpec((1, H), lambda i: (0, 0)),    # ln beta  (f32)
            ],
            out_specs=pl.BlockSpec((tm, H), lambda i: (i, 0)),
        ),
        compiler_params=pltpu.CompilerParams(
            dimension_semantics=("parallel",),
            vmem_limit_bytes=vmem_limit,
        ),
        cost_estimate=cost,
    )(x2, w, b2, r2, g2, be2)

    # TODO(synk): for configs with hidden_size < 128, fold rows into lanes
    # before the pallas_call to keep output stores lane-dense.
    return out2.reshape(B, S, H)


def _reference(hidden_states, input_tensor, w, b, gamma, beta, eps):
    h = jnp.einsum("bsi,ih->bsh",
                   hidden_states.astype(jnp.float32),
                   w.astype(jnp.float32))
    h = h + b.astype(jnp.float32) + input_tensor.astype(jnp.float32)
    mu = jnp.mean(h, axis=-1, keepdims=True)
    va = jnp.mean((h - mu) ** 2, axis=-1, keepdims=True)
    return (h - mu) / jnp.sqrt(va + eps) * gamma.astype(jnp.float32) \
        + beta.astype(jnp.float32)


if __name__ == "__main__":
    # Small synthetic config (lane-dense hidden size):
    # intermediate_size=512, hidden_size=256, layer_norm_eps=1e-12,
    # hidden_dropout_prob inactive in eval.
    batch, seq = 2, 256
    intermediate_size, hidden_size = 512, 256
    eps = 1e-12

    key = jax.random.PRNGKey(0)
    k_x, k_res, k_w, k_b, k_g, k_be = jax.random.split(key, 6)

    hidden_states = jax.random.normal(
        k_x, (batch, seq, intermediate_size), dtype=jnp.float32)
    input_tensor = jax.random.normal(
        k_res, (batch, seq, hidden_size), dtype=jnp.float32)

    # nn.Linear: weight (H, I), bias (H); we pass weight transposed as (I, H).
    w = (jax.random.normal(k_w, (intermediate_size, hidden_size),
                           dtype=jnp.float32) * 0.02)
    b = jax.random.normal(k_b, (hidden_size,), dtype=jnp.float32) * 0.02
    gamma = jnp.ones((hidden_size,), dtype=jnp.float32) \
        + 0.01 * jax.random.normal(k_g, (hidden_size,), dtype=jnp.float32)
    beta = 0.01 * jax.random.normal(k_be, (hidden_size,), dtype=jnp.float32)

    # f32 path.
    out = diffuser_output(hidden_states, input_tensor, w, b, gamma, beta,
                          eps=eps)
    out = jax.block_until_ready(out)
    ref = _reference(hidden_states, input_tensor, w, b, gamma, beta, eps)
    assert jnp.allclose(out, ref, atol=2e-3, rtol=2e-3), "f32 mismatch vs ref"

    # bf16 activation / bf16 weight path (full-rate MXU operands, f32 LN math).
    x_bf = hidden_states.astype(jnp.bfloat16)
    r_bf = input_tensor.astype(jnp.bfloat16)
    w_bf = w.astype(jnp.bfloat16)
    out_bf = diffuser_output(x_bf, r_bf, w_bf, b, gamma, beta, eps=eps)
    out_bf = jax.block_until_ready(out_bf)
    ref_bf = _reference(x_bf, r_bf, w_bf, b, gamma, beta, eps)
    assert jnp.allclose(out_bf.astype(jnp.float32), ref_bf,
                        atol=5e-2, rtol=5e-2), "bf16 mismatch vs ref"

    print("KERNEL_OK")
</pallas_src>

<mosaic_0001>
module attributes {stable_mosaic.version = 11 : i64} {
  func.func @_diffuser_output_kernel(%arg0: i32, %arg1: memref<256x512xf32, #tpu.memory_space<vmem>>, %arg2: memref<512x256xf32, #tpu.memory_space<vmem>>, %arg3: memref<1x256xf32, #tpu.memory_space<vmem>>, %arg4: memref<256x256xf32, #tpu.memory_space<vmem>>, %arg5: memref<1x256xf32, #tpu.memory_space<vmem>>, %arg6: memref<1x256xf32, #tpu.memory_space<vmem>>, %arg7: memref<256x256xf32, #tpu.memory_space<vmem>>) attributes {dimension_semantics = [#tpu.dimension_semantics<parallel>], iteration_bounds = array<i64: 2>, scalar_prefetch = 0 : i64, scratch_operands = 0 : i64, tpu.core_type = #tpu.core_type<tc>, window_params = [{transform_indices = @transform_0, window_bounds = array<i64: 256, 512>}, {pipeline_mode = #tpu.pipeline_mode<synchronous>, transform_indices = @transform_1, window_bounds = array<i64: 512, 256>}, {pipeline_mode = #tpu.pipeline_mode<synchronous>, transform_indices = @transform_2, window_bounds = array<i64: 1, 256>}, {transform_indices = @transform_3, window_bounds = array<i64: 256, 256>}, {pipeline_mode = #tpu.pipeline_mode<synchronous>, transform_indices = @transform_4, window_bounds = array<i64: 1, 256>}, {pipeline_mode = #tpu.pipeline_mode<synchronous>, transform_indices = @transform_5, window_bounds = array<i64: 1, 256>}, {transform_indices = @transform_6, window_bounds = array<i64: 256, 256>}]} {
    %c0 = arith.constant 0 : index
    %c0_0 = arith.constant 0 : index
    %0 = vector.load %arg1[%c0, %c0_0] : memref<256x512xf32, #tpu.memory_space<vmem>>, vector<256x512xf32>
    %c0_1 = arith.constant 0 : index
    %c0_2 = arith.constant 0 : index
    %1 = vector.load %arg2[%c0_1, %c0_2] : memref<512x256xf32, #tpu.memory_space<vmem>>, vector<512x256xf32>
    %cst = arith.constant dense<0.000000e+00> : vector<256x256xf32>
    %2 = tpu.matmul %0, %1, %cst {dimension_numbers = #tpu.dot_dimension_numbers<[1], [0], [0], [1], [0, 0, 1, 1], [], []>} : vector<256x512xf32>, vector<512x256xf32>, vector<256x256xf32> -> vector<256x256xf32>
    %c0_3 = arith.constant 0 : index
    %c0_4 = arith.constant 0 : index
    %3 = vector.load %arg3[%c0_3, %c0_4] : memref<1x256xf32, #tpu.memory_space<vmem>>, vector<1x256xf32>
    %4 = vector.broadcast %3 : vector<1x256xf32> to vector<256x256xf32>
    %5 = arith.addf %2, %4 : vector<256x256xf32>
    %c0_5 = arith.constant 0 : index
    %c0_6 = arith.constant 0 : index
    %6 = vector.load %arg4[%c0_5, %c0_6] : memref<256x256xf32, #tpu.memory_space<vmem>>, vector<256x256xf32>
    %7 = arith.addf %5, %6 : vector<256x256xf32>
    %cst_7 = arith.constant dense<0.000000e+00> : vector<256xf32>
    %8 = vector.multi_reduction <add>, %7, %cst_7 [1] : vector<256x256xf32> to vector<256xf32>
    %9 = vector.shape_cast %8 : vector<256xf32> to vector<256x1xf32>
    %cst_8 = arith.constant 2.560000e+02 : f32
    %10 = vector.broadcast %cst_8 : f32 to vector<256x1xf32>
    %11 = arith.divf %9, %10 : vector<256x1xf32>
    %12 = arith.mulf %7, %7 : vector<256x256xf32>
    %cst_9 = arith.constant dense<0.000000e+00> : vector<256xf32>
    %13 = vector.multi_reduction <add>, %12, %cst_9 [1] : vector<256x256xf32> to vector<256xf32>
    %14 = vector.shape_cast %13 : vector<256xf32> to vector<256x1xf32>
    %cst_10 = arith.constant 2.560000e+02 : f32
    %15 = vector.broadcast %cst_10 : f32 to vector<256x1xf32>
    %16 = arith.divf %14, %15 : vector<256x1xf32>
    %17 = arith.mulf %11, %11 : vector<256x1xf32>
    %18 = arith.subf %16, %17 : vector<256x1xf32>
    %cst_11 = arith.constant 0.000000e+00 : f32
    %19 = vector.broadcast %cst_11 : f32 to vector<256x1xf32>
    %20 = arith.maximumf %18, %19 : vector<256x1xf32>
    %cst_12 = arith.constant 9.99999996E-13 : f32
    %21 = vector.broadcast %cst_12 : f32 to vector<256x1xf32>
    %22 = arith.addf %20, %21 : vector<256x1xf32>
    %23 = math.rsqrt %22 : vector<256x1xf32>
    %24 = vector.broadcast %11 : vector<256x1xf32> to vector<256x256xf32>
    %25 = arith.subf %7, %24 : vector<256x256xf32>
    %26 = vector.broadcast %23 : vector<256x1xf32> to vector<256x256xf32>
    %27 = arith.mulf %25, %26 : vector<256x256xf32>
    %c0_13 = arith.constant 0 : index
    %c0_14 = arith.constant 0 : index
    %28 = vector.load %arg5[%c0_13, %c0_14] : memref<1x256xf32, #tpu.memory_space<vmem>>, vector<1x256xf32>
    %29 = vector.broadcast %28 : vector<1x256xf32> to vector<256x256xf32>
    %30 = arith.mulf %27, %29 : vector<256x256xf32>
    %c0_15 = arith.constant 0 : index
    %c0_16 = arith.constant 0 : index
    %31 = vector.load %arg6[%c0_15, %c0_16] : memref<1x256xf32, #tpu.memory_space<vmem>>, vector<1x256xf32>
    %32 = vector.broadcast %31 : vector<1x256xf32> to vector<256x256xf32>
    %33 = arith.addf %30, %32 : vector<256x256xf32>
    %c0_17 = arith.constant 0 : index
    %c0_18 = arith.constant 0 : index
    %34 = vector.load %arg7[%c0_17, %c0_18] : memref<256x256xf32, #tpu.memory_space<vmem>>, vector<256x256xf32>
    tpu.vector_store %arg7[%c0_17, %c0_18], %33 {strides = array<i32>} : memref<256x256xf32, #tpu.memory_space<vmem>>, vector<256x256xf32>,
    return
  }
  func.func @transform_0(%arg0: i32) -> (i32, i32) {
    %c0_i32 = arith.constant 0 : i32
    %c0_i32_0 = arith.constant 0 : i32
    return %arg0, %c0_i32 : i32, i32
  }
  func.func @transform_1(%arg0: i32) -> (i32, i32) {
    %c0_i32 = arith.constant 0 : i32
    %c0_i32_0 = arith.constant 0 : i32
    %c0_i32_1 = arith.constant 0 : i32
    return %c0_i32, %c0_i32_0 : i32, i32
  }
  func.func @transform_2(%arg0: i32) -> (i32, i32) {
    %c0_i32 = arith.constant 0 : i32
    %c0_i32_0 = arith.constant 0 : i32
    %c0_i32_1 = arith.constant 0 : i32
    return %c0_i32, %c0_i32_0 : i32, i32
  }
  func.func @transform_3(%arg0: i32) -> (i32, i32) {
    %c0_i32 = arith.constant 0 : i32
    %c0_i32_0 = arith.constant 0 : i32
    return %arg0, %c0_i32 : i32, i32
  }
  func.func @transform_4(%arg0: i32) -> (i32, i32) {
    %c0_i32 = arith.constant 0 : i32
    %c0_i32_0 = arith.constant 0 : i32
    %c0_i32_1 = arith.constant 0 : i32
    return %c0_i32, %c0_i32_0 : i32, i32
  }
  func.func @transform_5(%arg0: i32) -> (i32, i32) {
    %c0_i32 = arith.constant 0 : i32
    %c0_i32_0 = arith.constant 0 : i32
    %c0_i32_1 = arith.constant 0 : i32
    return %c0_i32, %c0_i32_0 : i32, i32
  }
  func.func @transform_6(%arg0: i32) -> (i32, i32) {
    %c0_i32 = arith.constant 0 : i32
    %c0_i32_0 = arith.constant 0 : i32
    return %arg0, %c0_i32 : i32, i32
  }
}

</mosaic_0001>

<bundles_post_ra>
// kernel: tpu_custom_call.1
= control target key start
LH: loop header
LB: loop body
LE: loop exit
PB: predicated region body
PF: predicated region fallthrough
CT: control target
= control target key end

     0   :  { %s4113_s0 = inlined_call_operand.hbm [shape: f32[512,512], index: 0, kind: input, shape index: {}]   ;;  %s4114_s1 = inlined_call_operand.hbm [shape: f32[512,256], index: 1, kind: input, shape index: {}]   ;;  %s4115_s2 = inlined_call_operand.vmem [shape: f32[1,256], index: 2, kind: input, shape index: {}]   ;;  %s4116_s3 = inlined_call_operand.hbm [shape: f32[512,256], index: 3, kind: input, shape index: {}]   ;;  %s4117_s4 = inlined_call_operand.vmem [shape: f32[1,256], index: 4, kind: input, shape index: {}]   ;;  %s4118_s5 = inlined_call_operand.vmem [shape: f32[1,256], index: 5, kind: input, shape index: {}]   ;;  %s4119_s6 = inlined_call_operand.hbm [shape: f32[512,256], index: 6, kind: output, shape index: {}]  }
   0x1   :  { %4151 = sst [smem:[#allocation41_spill]] %s4113_s0 }
   0x2   :  { %4152 = sst [smem:[#allocation42_spill]] %s4116_s3 }
   0x3   :  { %11 = vsyncpa [#allocation3], 0 }
   0x4   :  { %13 = vsyncpa [#allocation3 + $0x1], 0 }
   0x5   :  { %14 = vsyncpa [#allocation6], 0 }
   0x6   :  { %15 = vsyncpa [#allocation4], 0 }
   0x7   :  { %17 = vsyncpa [#allocation4 + $0x1], 0  ;;  %s2806_s21 = smov 0   ;;  %s2808_s22 = smov 0  }
   0x8   :  { %s2810_s23 = smov 0   ;;  %s2812_s24 = smov 0  }
   0x9 LB: > { %s2827_s25 = sadd.s32 1, %s2759_s24   ;;  %s30_s26 = sadd.s32 1, %s2755_s23  ;;  %s2759_s24 = sphi %s2812_s24, %s4227_s24   ;;  %s2755_s23 = sphi %s2810_s23, %s4226_s23   ;;  %s2751_s22 = sphi %s2808_s22, %s4225_s22   ;;  %s2747_s21 = sphi %s2806_s21, %s4224_s21  }
   0xa   : > { %s27_s27 = ssub.s32 %s2759_s24, %s2827_s25  ;;  %p37_p0 = scmp.ne.s32.totalorder %s2755_s23, %s2751_s22 }
   0xb   : > { %p28_p1 = scmp.eq.s32.totalorder %s27_s27, 0  ;;  %p38_p2 = scmp.eq.s32.totalorder %s2759_s24, 0 }
   0xc   : > { %p2491_p4 = scmp.lt.s32.totalorder %s2759_s24, 2  ;;  %s225_s29 = sand.u32 1, %s2759_s24  }
   0xd   : > { %s2838_s28 = scalar_select %p28_p1, %s2755_s23, %s30_s26  }
   0xe   : > { %p39_p5 = por %p38_p2, %p37_p0  ;;  %s227_s30 = sand.u32 1, %s2755_s23  }
   0xf   : > { %4153 = sst [smem:[#allocation13_spill]] %s2838_s28  ;;  %s2184_s7 = sshll.u32 %s227_s30, 10 }
  0x10   : > { %s2204_s8 = sshll.u32 %s2759_s24, 14  ;;  %s4154_s0 = sld [smem:[#allocation41_spill]] }
  0x11   : > { %s229_s12 = scalar_lea.vmem [#allocation2], %s2184_s7  ;;  %p2853_p6 = pnand %p2491_p4, %p39_p5 }
  0x12   : > { %s237_s13 = sshll.u32 %s229_s12, 4  ;;  %s2859_s15 = scalar_lea.sflag [#allocation3], %s225_s29  ;;  %s2857_s13 = int_to_ptr.vmem [resolvable:$true] %s237_s13 }
  0x13   : > { %p2599_p8 = pneg %p2853_p6 }
  0x16   : > { %s2851_s11 = scalar_lea.hbm %s4154_s0, %s2204_s8  ;;  %s2602_s19 = scalar_lea.hbm %s4154_s0, 32768 }
  0x17   : > { %s2597_s16 = scalar_lea.hbm %s2851_s11, 16384  ;;  %p2603_p11 = scmp.lt.u32.totalorder %s2851_s11, %s4154_s0 }
  0x18   : > { %p2598_p7 = scmp.ne.s32.totalorder %s2851_s11, %s2597_s16  ;;  %p2604_p12 = scmp.lt.u32.totalorder %s2602_s19, %s2597_s16 }
  0x19   : > { %p2606_p1 = scmp.lt.u32.totalorder %s2597_s16, %s2851_s11 }
  0x1a   : > { %p2600_p9 = pnand %p2599_p8, %p2598_p7  ;;  %p2605_p13 = por %p2604_p12, %p2603_p11 }
  0x1c   : > { %p2601_p10 = pneg %p2600_p9  ;;  %p2607_p2 = por %p2606_p1, %p2605_p13 }
  0x1e   : > { %p2608_p4 = pnand %p2607_p2, %p2601_p10 }
  0x20   : > { %2611 = shalt.err (!%p2608_p4)
}
  0x21   : > { %s2612_s27 = scalar_lea.vmem %s2857_s13, 16384  ;;  %s2761_s29 = smov [#allocation2]  }
  0x22   : > { %p2613_p5 = scmp.ne.s32.totalorder %s2857_s13, %s2612_s27  ;;  %s2617_s7 = sshll.u32 %s2761_s29, 4  ;;  %s2618_s7 = int_to_ptr.vmem [resolvable:$false] %s2617_s7 }
  0x23   : > { %s2619_s8 = scalar_lea.vmem %s2618_s7, 32768  ;;  %p2620_p3 = scmp.lt.s32.totalorder %s2857_s13, %s2618_s7 }
  0x24   : > { %p2615_p7 = pnand %p2613_p5, %p2599_p8  ;;  %p2621_p11 = scmp.lt.s32.totalorder %s2619_s8, %s2612_s27 }
  0x26   : > { %p2616_p9 = pneg %p2615_p7  ;;  %p2622_p12 = por %p2621_p11, %p2620_p3 }
  0x28   : > { %p2623_p13 = pnand %p2622_p12, %p2616_p9 }
  0x2a   : > { %2626 = shalt.err (!%p2623_p13)
}
  0x2b   : > { %s2762_s9 = smov 512   ;;  %s2763_s10 = smov 32  }
  0x2c   : > { %2482 = dma.hbm_to_vmem [thread:$0]  (!%p2853_p6), %s2851_s11, 16384, %s2857_s13, %s2859_s15, %s2762_s9, %s2762_s9, %s2763_s10  }
  0x2d   : > { %s2188_s12 = sshll.u32 %s227_s30, 9  ;;  %s2890_s18 = sadd.s32 4294967295, %s2759_s24  }
  0x2e   : > { %s251_s16 = scalar_lea.vmem [#allocation7], %s2188_s12  ;;  %s2180_s19 = sadd.s32 4294967294, %s2759_s24  }
  0x2f   : > { %s259_s17 = sshll.u32 %s251_s16, 4  ;;  %p43_p3 = scmp.ne.s32.totalorder %s2751_s22, %s2747_s21  ;;  %s2925_s17 = int_to_ptr.vmem [resolvable:$true] %s259_s17 }
  0x30   : > { %p4120_p10 = scmp.eq.s32.totalorder %s2890_s18, 0  ;;  %p177_p1 = scmp.eq.s32.totalorder %s2890_s18, 1 }
  0x31   : > { %p183_p2 = scmp.eq.s32.totalorder %s2180_s19, 1  ;;  %p2181_p4 = scmp.ge.s32.totalorder %s2759_s24, 1 }
  0x32   : > { %p2900_p5 = por %p4120_p10, %p43_p3  ;;  %p2907_p7 = por %p177_p1, %p37_p0 }
  0x33   : > { %p2911_p9 = por %p183_p2, %p43_p3  ;;  %p190_p11 = scmp.lt.s32.totalorder %s2759_s24, 3 }
  0x34   : > { %s4156_s11 = scalar_select %p2900_p5, 1, 0 }
  0x35   : > { %s4157_s30 = scalar_select %p2907_p7, 1, 0 }
  0x36   : > { %s4158_s13 = scalar_select %p2911_p9, 1, 0 }
  0x37   : > { %p2916_p12 = pnand %p2181_p4, %p190_p11  ;;  %s2764_s26 = smov [#allocation5]  }
  0x38   : > { %s202_s27 = sshll.u32 %s2764_s26, 4  ;;  %s2206_s29 = sshll.u32 %s2759_s24, 13  ;;  %s2920_s27 = int_to_ptr.vmem [resolvable:$true] %s202_s27 }
  0x39   : > { %s4159_s20 = scalar_select %p2916_p12, 1, 0 }
  0x3a   : > { %p2475_p13 = pneg %p2916_p12  ;;  %s4161_s3 = sld [smem:[#allocation42_spill]] }
  0x3c   : > { %p2929_p0 = pnand %p2475_p13, %p4120_p10 }
  0x40   : > { %s2936_s10 = scalar_lea.hbm %s4161_s3, %s2206_s29  ;;  %s2632_s26 = scalar_lea.hbm %s4161_s3, 16384 }
  0x41   : > { %s2627_s12 = scalar_lea.hbm %s2936_s10, 8192  ;;  %p2633_p4 = scmp.lt.u32.totalorder %s2936_s10, %s4161_s3 }
  0x42   : > { %p2628_p3 = scmp.ne.s32.totalorder %s2936_s10, %s2627_s12  ;;  %p2634_p11 = scmp.lt.u32.totalorder %s2632_s26, %s2627_s12 }
  0x43   : > { %p2636_p10 = scmp.lt.u32.totalorder %s2627_s12, %s2936_s10 }
  0x44   : > { %p2630_p1 = pnand %p2628_p3, %p2599_p8  ;;  %p2635_p13 = por %p2634_p11, %p2633_p4 }
  0x46   : > { %p2631_p2 = pneg %p2630_p1  ;;  %p2637_p9 = por %p2636_p10, %p2635_p13 }
  0x48   : > { %p2638_p7 = pnand %p2637_p9, %p2631_p2 }
  0x4a   : > { %2641 = shalt.err (!%p2638_p7)
}
  0x4b   : > { %s2642_s29 = scalar_lea.vmem %s2925_s17, 8192  ;;  %s2765_s8 = smov [#allocation7]  }
  0x4c   : > { %p2643_p3 = scmp.ne.s32.totalorder %s2925_s17, %s2642_s29  ;;  %s2647_s9 = sshll.u32 %s2765_s8, 4  ;;  %s2648_s9 = int_to_ptr.vmem [resolvable:$false] %s2647_s9 }
  0x4d   : > { %s2649_s0 = scalar_lea.vmem %s2648_s9, 16384  ;;  %p2650_p12 = scmp.lt.s32.totalorder %s2925_s17, %s2648_s9 }
  0x4e   : > { %p2645_p1 = pnand %p2643_p3, %p2599_p8  ;;  %p2651_p4 = scmp.lt.s32.totalorder %s2649_s0, %s2642_s29 }
  0x50   : > { %p2646_p5 = pneg %p2645_p1  ;;  %p2652_p11 = por %p2651_p4, %p2650_p12 }
  0x52   : > { %p2653_p10 = pnand %p2652_p11, %p2646_p5 }
  0x54   : > { %2656 = shalt.err (!%p2653_p10)
}
  0x55   : > { %s2766_s28 = smov 256   ;;  %s2767_s12 = smov 16  }
  0x56   : > { %2485 = dma.hbm_to_vmem [thread:$0]  (!%p2853_p6), %s2936_s10, 8192, %s2925_s17, %s2859_s15, %s2766_s28, %s2766_s28, %s2767_s12  }
  0x57   : > { %s2657_s26 = scalar_lea.hbm %s4114_s1, 16384  ;;  %p2659_p5 = pneg %p2929_p0 }
  0x58   : > { %p2658_p8 = scmp.ne.s32.totalorder %s4114_s1, %s2657_s26  ;;  %p2664_p12 = scmp.lt.u32.totalorder %s2657_s26, %s4114_s1 }
  0x5a   : > { %p2660_p7 = pnand %p2659_p5, %p2658_p8 }
  0x5c   : > { %p2661_p9 = pneg %p2660_p7 }
  0x5e   : > { %p2666_p2 = pnand %p2664_p12, %p2661_p9 }
  0x60   : > { %2669 = shalt.err (!%p2666_p2)
}
  0x61   : > { %s2670_s14 = scalar_lea.vmem %s2920_s27, 16384  ;;  %p2678_p1 = scmp.lt.s32.totalorder %s2920_s27, %s2920_s27 }
  0x62   : > { %p2671_p6 = scmp.ne.s32.totalorder %s2920_s27, %s2670_s14  ;;  %p2679_p4 = scmp.lt.s32.totalorder %s2670_s14, %s2670_s14 }
  0x64   : > { %p2673_p13 = pnand %p2671_p6, %p2659_p5  ;;  %p2680_p11 = por %p2679_p4, %p2678_p1 }
  0x66   : > { %p2674_p3 = pneg %p2673_p13 }
  0x68   : > { %p2681_p10 = pnand %p2680_p11, %p2674_p3 }
  0x6a   : > { %2684 = shalt.err (!%p2681_p10)
}
  0x6b   : > { %2478 = dma.hbm_to_vmem [thread:$0]  (!%p2929_p0), %s4114_s1, 16384, %s2920_s27, [#allocation6], %s2766_s28, %s2766_s28, %s2767_s12  }
  0x6c   : > { %p4162_p8 = scmp.ne.s32.totalorder %s4159_s20, 0 }
  0x6e   : > { %271 = sbr.rel (%p4162_p8) target bundleno = 728 (0x2d8), region = 44 }
  0x75   : > { %s273_s17 = sand.u32 1, %s2890_s18   ;;  %s2987_s10 = sand.u32 1, %s2751_s22  }
  0x76   : > { %s2193_s0 = sshll.u32 %s2987_s10, 10  ;;  %s274_s16 = scalar_lea.sflag [#allocation3], %s273_s17 }
  0x77   : > { %s2990_s19 = scalar_lea.vmem [#allocation2], %s2193_s0  ;;  %p4163_p5 = scmp.ne.s32.totalorder %s4156_s11, 0 }
  0x79   : > { %2730 = dma.done.wait (%p4163_p5), %s274_s16, 16384  }
  0x7a   : > { %2732 = vsyncadd (%p4163_p5), %s274_s16, 4294950912  ;;  %p4164_p0 = scmp.eq.s32.totalorder %s2890_s18, 0 }
  0x7c   : > { %2734 = dma.done.wait (%p4164_p0), [#allocation6], 16384   ;;  %p4165_p7 = pmov %p4164_p0 }
  0x7d   : > { %s2195_s20 = sshll.u32 %s2987_s10, 9 }
  0x7e   : > { %2736 = vsyncadd (%p4165_p7), [#allocation6], 4294950912  ;;  %s3003_s27 = scalar_lea.vmem [#allocation7], %s2195_s20 }
  0x7f   : > { %2738 = dma.done.wait (%p4163_p5), %s274_s16, 8192  }
  0x80   : > { %2740 = vsyncadd (%p4163_p5), %s274_s16, 4294959104  ;;  %v456_v0 = vld [vmem:[#allocation5 + $0x8] sm:$0xff]  ;;  %v458_v1 = vld [vmem:[#allocation5 + $0x18] sm:$0xff]  ;;  %s3652_s29 = scalar_lea.vmem [#allocation8], %s2195_s20  ;;  %s2208_s9 = sshll.u32 %s2890_s18, 13 }
  0x81   : > { %v455_v2 = vld [vmem:[#allocation5] sm:$0xff]  ;;  %v2209_v3 = vpack.c.bf16 %v458_v1, %v456_v0  ;;  %v457_v4 = vld [vmem:[#allocation5 + $0x10] sm:$0xff]  ;;  %v520_v5 = vld [vmem:[#allocation5 + $0x208] sm:$0xff]  ;;  %s2077_s14 = sshll.u32 %s3652_s29, 4  ;;  %s4063_s17 = scalar_lea.hbm %s4119_s6, %s2208_s9  ;;  %s4065_s14 = int_to_ptr.vmem [resolvable:$true] %s2077_s14 }
  0x82   : > { %v522_v6 = vld [vmem:[#allocation5 + $0x218] sm:$0xff]  ;;  %v2211_v7 = vpack.c.bf16 %v457_v4, %v455_v2  ;;  %v519_v9 = vld [vmem:[#allocation5 + $0x200] sm:$0xff]  ;;  %v521_v10 = vld [vmem:[#allocation5 + $0x210] sm:$0xff]  ;;  %s2063_s18 = scalar_lea.sflag [#allocation4], %s2987_s10  ;;  %s2685_s0 = scalar_lea.vmem %s4065_s14, 8192 }
  0x83   : > { %v2273_v8 = vpack.c.bf16 %v522_v6, %v520_v5  ;;  %v460_v11 = vld [vmem:[#allocation5 + $0x28] sm:$0xff]  ;;  %2210 = vmatprep.subr.bf16.mxu1 %v2209_v3  ;;  %v2275_v12 = vpack.c.bf16 %v521_v10, %v519_v9  ;;  %v462_v13 = vld [vmem:[#allocation5 + $0x38] sm:$0xff]  ;;  %v459_v14 = vld [vmem:[#allocation5 + $0x20] sm:$0xff]  ;;  %p2686_p9 = scmp.ne.s32.totalorder %s4065_s14, %s2685_s0  ;;  %p4220_p12 = scmp.ne.s32.totalorder %s4157_s30, 0 }
  0x84   : > { %v461_v15 = vld [vmem:[#allocation5 + $0x30] sm:$0xff]  ;;  %2212 = vmatpush1.bf16.msra.mxu1 %v2211_v7  ;;  %v2213_v16 = vpack.c.bf16 %v462_v13, %v460_v11  ;;  %v524_v18 = vld [vmem:[#allocation5 + $0x228] sm:$0xff]  ;;  %v526_v19 = vld [vmem:[#allocation5 + $0x238] sm:$0xff]  ;;  %s2768_s16 = smov [#allocation8]  }
  0x85   : > { %2274 = vmatprep.subr.bf16.mxu0 %v2273_v8  ;;  %v2215_v17 = vpack.c.bf16 %v461_v15, %v459_v14  ;;  %v523_v20 = vld [vmem:[#allocation5 + $0x220] sm:$0xff]  ;;  %v2277_v21 = vpack.c.bf16 %v526_v19, %v524_v18  ;;  %v525_v22 = vld [vmem:[#allocation5 + $0x230] sm:$0xff]  ;;  %v464_v23 = vld [vmem:[#allocation5 + $0x48] sm:$0xff]  ;;  %p2687_p2 = pnand %p2686_p9, %p4220_p12 }
  0x86   : > { %2276 = vmatpush1.bf16.msra.mxu0 %v2275_v12  ;;  %v466_v24 = vld [vmem:[#allocation5 + $0x58] sm:$0xff]  ;;  %2214 = vmatprep.subr.bf16.mxu1 %v2213_v16  ;;  %v2279_v25 = vpack.c.bf16 %v525_v22, %v523_v20  ;;  %v463_v27 = vld [vmem:[#allocation5 + $0x40] sm:$0xff]  ;;  %v465_v28 = vld [vmem:[#allocation5 + $0x50] sm:$0xff] }
  0x87   : > { %v2217_v26 = vpack.c.bf16 %v466_v24, %v464_v23  ;;  %v528_v29 = vld [vmem:[#allocation5 + $0x248] sm:$0xff]  ;;  %2278 = vmatprep.subr.bf16.mxu0 %v2277_v21  ;;  %v530_v30 = vld [vmem:[#allocation5 + $0x258] sm:$0xff]  ;;  %v527_v31 = vld [vmem:[#allocation5 + $0x240] sm:$0xff]  ;;  %v2219_v33 = vpack.c.bf16 %v465_v28, %v463_v27  ;;  %p2688_p6 = pneg %p2687_p2 }
  0x88   : > { %v529_v32 = vld [vmem:[#allocation5 + $0x250] sm:$0xff]  ;;  %2216 = vmatpush1.bf16.msra.mxu1 %v2215_v17  ;;  %v2281_v34 = vpack.c.bf16 %v530_v30, %v528_v29  ;;  %v468_v35 = vld [vmem:[#allocation5 + $0x68] sm:$0xff]  ;;  %v470_v36 = vld [vmem:[#allocation5 + $0x78] sm:$0xff] }
  0x89   : > { %v467_v37 = vld [vmem:[#allocation5 + $0x60] sm:$0xff]  ;;  %2218 = vmatprep.subr.bf16.mxu1 %v2217_v26  ;;  %v2283_v38 = vpack.c.bf16 %v529_v32, %v527_v31  ;;  %v2221_v39 = vpack.c.bf16 %v470_v36, %v468_v35  ;;  %v469_v40 = vld [vmem:[#allocation5 + $0x70] sm:$0xff]  ;;  %v532_v41 = vld [vmem:[#allocation5 + $0x268] sm:$0xff] }
  0x8a   : > { %2280 = vmatpush1.bf16.msra.mxu0 %v2279_v25  ;;  %v534_v42 = vld [vmem:[#allocation5 + $0x278] sm:$0xff]  ;;  %v531_v44 = vld [vmem:[#allocation5 + $0x260] sm:$0xff]  ;;  %v533_v45 = vld [vmem:[#allocation5 + $0x270] sm:$0xff]  ;;  %v2223_v48 = vpack.c.bf16 %v469_v40, %v467_v37 }
  0x8b   : > { %2282 = vmatprep.subr.bf16.mxu0 %v2281_v34  ;;  %v2285_v43 = vpack.c.bf16 %v534_v42, %v532_v41  ;;  %v472_v46 = vld [vmem:[#allocation5 + $0x88] sm:$0xff]  ;;  %v474_v47 = vld [vmem:[#allocation5 + $0x98] sm:$0xff]  ;;  %v2287_v51 = vpack.c.bf16 %v533_v45, %v531_v44  ;;  %v471_v53 = vld [vmem:[#allocation5 + $0x80] sm:$0xff] }
  0x8c   : > { %2220 = vmatpush1.bf16.msra.mxu1 %v2219_v33  ;;  %v536_v49 = vld [vmem:[#allocation5 + $0x288] sm:$0xff]  ;;  %v538_v50 = vld [vmem:[#allocation5 + $0x298] sm:$0xff]  ;;  %v2225_v52 = vpack.c.bf16 %v474_v47, %v472_v46  ;;  %v473_v54 = vld [vmem:[#allocation5 + $0x90] sm:$0xff] }
  0x8d   : > { %2222 = vmatprep.subr.bf16.mxu1 %v2221_v39  ;;  %v535_v55 = vld [vmem:[#allocation5 + $0x280] sm:$0xff]  ;;  %v2289_v56 = vpack.c.bf16 %v538_v50, %v536_v49  ;;  %v537_v57 = vld [vmem:[#allocation5 + $0x290] sm:$0xff]  ;;  %v476_v58 = vld [vmem:[#allocation5 + $0xa8] sm:$0xff]  ;;  %v2227_v62 = vpack.c.bf16 %v473_v54, %v471_v53 }
  0x8e   : > { %2284 = vmatpush1.bf16.msra.mxu0 %v2283_v38  ;;  %v478_v59 = vld [vmem:[#allocation5 + $0xb8] sm:$0xff]  ;;  %v540_v60 = vld [vmem:[#allocation5 + $0x2a8] sm:$0xff]  ;;  %v2291_v63 = vpack.c.bf16 %v537_v57, %v535_v55  ;;  %v475_v1 = vld [vmem:[#allocation5 + $0xa0] sm:$0xff] }
  0x8f   : > { %2286 = vmatprep.subr.bf16.mxu0 %v2285_v43  ;;  %v542_v61 = vld [vmem:[#allocation5 + $0x2b8] sm:$0xff]  ;;  %v2229_v0 = vpack.c.bf16 %v478_v59, %v476_v58  ;;  %v477_v2 = vld [vmem:[#allocation5 + $0xb0] sm:$0xff]  ;;  %v539_v3 = vld [vmem:[#allocation5 + $0x2a0] sm:$0xff] }
  0x90   : > { %2224 = vmatpush1.bf16.msra.mxu1 %v2223_v48  ;;  %v2293_v4 = vpack.c.bf16 %v542_v61, %v540_v60  ;;  %v541_v5 = vld [vmem:[#allocation5 + $0x2b0] sm:$0xff]  ;;  %v480_v6 = vld [vmem:[#allocation5 + $0xc8] sm:$0xff]  ;;  %v482_v7 = vld [vmem:[#allocation5 + $0xd8] sm:$0xff]  ;;  %v2231_v10 = vpack.c.bf16 %v477_v2, %v475_v1 }
  0x91   : > { %2226 = vmatprep.subr.bf16.mxu1 %v2225_v52  ;;  %v544_v8 = vld [vmem:[#allocation5 + $0x2c8] sm:$0xff]  ;;  %v546_v9 = vld [vmem:[#allocation5 + $0x2d8] sm:$0xff]  ;;  %v2295_v11 = vpack.c.bf16 %v541_v5, %v539_v3  ;;  %v2233_v12 = vpack.c.bf16 %v482_v7, %v480_v6  ;;  %v479_v13 = vld [vmem:[#allocation5 + $0xc0] sm:$0xff] }
  0x92   : > { %2288 = vmatpush1.bf16.msra.mxu0 %v2287_v51  ;;  %v481_v14 = vld [vmem:[#allocation5 + $0xd0] sm:$0xff]  ;;  %v543_v15 = vld [vmem:[#allocation5 + $0x2c0] sm:$0xff]  ;;  %v2297_v16 = vpack.c.bf16 %v546_v9, %v544_v8  ;;  %v484_v18 = vld [vmem:[#allocation5 + $0xe8] sm:$0xff] }
  0x93   : > { %2290 = vmatprep.subr.bf16.mxu0 %v2289_v56  ;;  %v545_v17 = vld [vmem:[#allocation5 + $0x2d0] sm:$0xff]  ;;  %v486_v19 = vld [vmem:[#allocation5 + $0xf8] sm:$0xff]  ;;  %v548_v20 = vld [vmem:[#allocation5 + $0x2e8] sm:$0xff]  ;;  %v2235_v22 = vpack.c.bf16 %v481_v14, %v479_v13 }
  0x94   : > { %2228 = vmatpush1.bf16.msra.mxu1 %v2227_v62  ;;  %v550_v21 = vld [vmem:[#allocation5 + $0x2f8] sm:$0xff]  ;;  %v2299_v23 = vpack.c.bf16 %v545_v17, %v543_v15  ;;  %v2237_v24 = vpack.c.bf16 %v486_v19, %v484_v18  ;;  %v483_v25 = vld [vmem:[#allocation5 + $0xe0] sm:$0xff]  ;;  %v485_v26 = vld [vmem:[#allocation5 + $0xf0] sm:$0xff] }
  0x95   : > { %2230 = vmatprep.subr.bf16.mxu1 %v2229_v0  ;;  %v547_v27 = vld [vmem:[#allocation5 + $0x2e0] sm:$0xff]  ;;  %v2301_v28 = vpack.c.bf16 %v550_v21, %v548_v20  ;;  %v549_v29 = vld [vmem:[#allocation5 + $0x2f0] sm:$0xff]  ;;  %v488_v30 = vld [vmem:[#allocation5 + $0x108] sm:$0xff]  ;;  %v2239_v34 = vpack.c.bf16 %v485_v26, %v483_v25 }
  0x96   : > { %2292 = vmatpush1.bf16.msra.mxu0 %v2291_v63  ;;  %v490_v31 = vld [vmem:[#allocation5 + $0x118] sm:$0xff]  ;;  %v552_v32 = vld [vmem:[#allocation5 + $0x308] sm:$0xff]  ;;  %v2303_v35 = vpack.c.bf16 %v549_v29, %v547_v27  ;;  %v487_v37 = vld [vmem:[#allocation5 + $0x100] sm:$0xff] }
  0x97   : > { %2294 = vmatprep.subr.bf16.mxu0 %v2293_v4  ;;  %v554_v33 = vld [vmem:[#allocation5 + $0x318] sm:$0xff]  ;;  %v2241_v36 = vpack.c.bf16 %v490_v31, %v488_v30  ;;  %v489_v38 = vld [vmem:[#allocation5 + $0x110] sm:$0xff]  ;;  %v551_v39 = vld [vmem:[#allocation5 + $0x300] sm:$0xff] }
  0x98   : > { %2232 = vmatpush1.bf16.msra.mxu1 %v2231_v10  ;;  %v2305_v40 = vpack.c.bf16 %v554_v33, %v552_v32  ;;  %v553_v41 = vld [vmem:[#allocation5 + $0x310] sm:$0xff]  ;;  %v492_v42 = vld [vmem:[#allocation5 + $0x128] sm:$0xff]  ;;  %v494_v43 = vld [vmem:[#allocation5 + $0x138] sm:$0xff]  ;;  %v2243_v46 = vpack.c.bf16 %v489_v38, %v487_v37 }
  0x99   : > { %2234 = vmatprep.subr.bf16.mxu1 %v2233_v12  ;;  %v556_v44 = vld [vmem:[#allocation5 + $0x328] sm:$0xff]  ;;  %v558_v45 = vld [vmem:[#allocation5 + $0x338] sm:$0xff]  ;;  %v2307_v47 = vpack.c.bf16 %v553_v41, %v551_v39  ;;  %v2245_v48 = vpack.c.bf16 %v494_v43, %v492_v42  ;;  %v491_v49 = vld [vmem:[#allocation5 + $0x120] sm:$0xff] }
  0x9a   : > { %2296 = vmatpush1.bf16.msra.mxu0 %v2295_v11  ;;  %v493_v50 = vld [vmem:[#allocation5 + $0x130] sm:$0xff]  ;;  %v555_v51 = vld [vmem:[#allocation5 + $0x320] sm:$0xff]  ;;  %v2309_v52 = vpack.c.bf16 %v558_v45, %v556_v44  ;;  %v496_v54 = vld [vmem:[#allocation5 + $0x148] sm:$0xff] }
  0x9b   : > { %2298 = vmatprep.subr.bf16.mxu0 %v2297_v16  ;;  %v557_v53 = vld [vmem:[#allocation5 + $0x330] sm:$0xff]  ;;  %v498_v55 = vld [vmem:[#allocation5 + $0x158] sm:$0xff]  ;;  %v560_v56 = vld [vmem:[#allocation5 + $0x348] sm:$0xff]  ;;  %v2247_v58 = vpack.c.bf16 %v493_v50, %v491_v49 }
  0x9c   : > { %2236 = vmatpush1.bf16.msra.mxu1 %v2235_v22  ;;  %v562_v57 = vld [vmem:[#allocation5 + $0x358] sm:$0xff]  ;;  %v2311_v59 = vpack.c.bf16 %v557_v53, %v555_v51  ;;  %v2249_v60 = vpack.c.bf16 %v498_v55, %v496_v54  ;;  %v495_v61 = vld [vmem:[#allocation5 + $0x140] sm:$0xff]  ;;  %v497_v62 = vld [vmem:[#allocation5 + $0x150] sm:$0xff] }
  0x9d   : > { %2238 = vmatprep.subr.bf16.mxu1 %v2237_v24  ;;  %v559_v63 = vld [vmem:[#allocation5 + $0x340] sm:$0xff]  ;;  %v2313_v0 = vpack.c.bf16 %v562_v57, %v560_v56  ;;  %v561_v1 = vld [vmem:[#allocation5 + $0x350] sm:$0xff]  ;;  %v500_v2 = vld [vmem:[#allocation5 + $0x168] sm:$0xff]  ;;  %v2251_v6 = vpack.c.bf16 %v497_v62, %v495_v61 }
  0x9e   : > { %2300 = vmatpush1.bf16.msra.mxu0 %v2299_v23  ;;  %v502_v3 = vld [vmem:[#allocation5 + $0x178] sm:$0xff]  ;;  %v564_v4 = vld [vmem:[#allocation5 + $0x368] sm:$0xff]  ;;  %v499_v7 = vld [vmem:[#allocation5 + $0x160] sm:$0xff]  ;;  %v2315_v8 = vpack.c.bf16 %v561_v1, %v559_v63 }
  0x9f   : > { %2302 = vmatprep.subr.bf16.mxu0 %v2301_v28  ;;  %v566_v5 = vld [vmem:[#allocation5 + $0x378] sm:$0xff]  ;;  %v2253_v9 = vpack.c.bf16 %v502_v3, %v500_v2  ;;  %v501_v10 = vld [vmem:[#allocation5 + $0x170] sm:$0xff]  ;;  %v563_v11 = vld [vmem:[#allocation5 + $0x360] sm:$0xff] }
  0xa0   : > { %2240 = vmatpush1.bf16.msra.mxu1 %v2239_v34  ;;  %v565_v12 = vld [vmem:[#allocation5 + $0x370] sm:$0xff]  ;;  %v2317_v13 = vpack.c.bf16 %v566_v5, %v564_v4  ;;  %v504_v14 = vld [vmem:[#allocation5 + $0x188] sm:$0xff]  ;;  %v506_v15 = vld [vmem:[#allocation5 + $0x198] sm:$0xff]  ;;  %v2255_v20 = vpack.c.bf16 %v501_v10, %v499_v7 }
  0xa1   : > { %2242 = vmatprep.subr.bf16.mxu1 %v2241_v36  ;;  %v328_v16 = vld [vmem:[%s2990_s19 + $0x8] sm:$0xff]  ;;  %v570_v18 = vld [vmem:[#allocation5 + $0x398] sm:$0xff]  ;;  %v2319_v21 = vpack.c.bf16 %v565_v12, %v563_v11  ;;  %v2257_v22 = vpack.c.bf16 %v506_v15, %v504_v14  ;;  %v503_v23 = vld [vmem:[#allocation5 + $0x180] sm:$0xff] }
  0xa2   : > { %2304 = vmatpush1.bf16.msra.mxu0 %v2303_v35  ;;  %v568_v17 = vld [vmem:[#allocation5 + $0x388] sm:$0xff]  ;;  %659 = vmatprep.mubr.f32.mxu1 %v328_v16  ;;  %v330_v19 = vld [vmem:[%s2990_s19 + $0x18] sm:$0xff]  ;;  %v505_v24 = vld [vmem:[#allocation5 + $0x190] sm:$0xff] }
  0xa3   : > { %2306 = vmatprep.subr.bf16.mxu0 %v2305_v40  ;;  %916 = vmatprep.mubr.f32.mxu0 %v330_v19  ;;  %v567_v25 = vld [vmem:[#allocation5 + $0x380] sm:$0xff]  ;;  %v2321_v26 = vpack.c.bf16 %v570_v18, %v568_v17  ;;  %v569_v27 = vld [vmem:[#allocation5 + $0x390] sm:$0xff]  ;;  %v508_v28 = vld [vmem:[#allocation5 + $0x1a8] sm:$0xff]  ;;  %v2259_v32 = vpack.c.bf16 %v505_v24, %v503_v23 }
  0xa4   : > { %2244 = vmatpush1.bf16.msra.mxu1 %v2243_v46  ;;  %v510_v29 = vld [vmem:[#allocation5 + $0x1b8] sm:$0xff]  ;;  %v572_v30 = vld [vmem:[#allocation5 + $0x3a8] sm:$0xff]  ;;  %v2323_v33 = vpack.c.bf16 %v569_v27, %v567_v25  ;;  %v507_v35 = vld [vmem:[#allocation5 + $0x1a0] sm:$0xff] }
  0xa5   : > { %2246 = vmatprep.subr.bf16.mxu1 %v2245_v48  ;;  %v574_v31 = vld [vmem:[#allocation5 + $0x3b8] sm:$0xff]  ;;  %v2261_v34 = vpack.c.bf16 %v510_v29, %v508_v28  ;;  %v509_v36 = vld [vmem:[#allocation5 + $0x1b0] sm:$0xff]  ;;  %v571_v37 = vld [vmem:[#allocation5 + $0x3a0] sm:$0xff] }
  0xa6   : > { %2308 = vmatpush1.bf16.msra.mxu0 %v2307_v47  ;;  %v2325_v38 = vpack.c.bf16 %v574_v31, %v572_v30  ;;  %v573_v39 = vld [vmem:[#allocation5 + $0x3b0] sm:$0xff]  ;;  %v512_v40 = vld [vmem:[#allocation5 + $0x1c8] sm:$0xff]  ;;  %v514_v41 = vld [vmem:[#allocation5 + $0x1d8] sm:$0xff]  ;;  %v2263_v44 = vpack.c.bf16 %v509_v36, %v507_v35 }
  0xa7   : > { %2310 = vmatprep.subr.bf16.mxu0 %v2309_v52  ;;  %v576_v42 = vld [vmem:[#allocation5 + $0x3c8] sm:$0xff]  ;;  %v578_v43 = vld [vmem:[#allocation5 + $0x3d8] sm:$0xff]  ;;  %v2327_v45 = vpack.c.bf16 %v573_v39, %v571_v37  ;;  %v2265_v46 = vpack.c.bf16 %v514_v41, %v512_v40  ;;  %v511_v47 = vld [vmem:[#allocation5 + $0x1c0] sm:$0xff] }
  0xa8   : > { %2248 = vmatpush1.bf16.msra.mxu1 %v2247_v58  ;;  %v513_v48 = vld [vmem:[#allocation5 + $0x1d0] sm:$0xff]  ;;  %v575_v49 = vld [vmem:[#allocation5 + $0x3c0] sm:$0xff]  ;;  %v2329_v50 = vpack.c.bf16 %v578_v43, %v576_v42  ;;  %v516_v52 = vld [vmem:[#allocation5 + $0x1e8] sm:$0xff] }
  0xa9   : > { %2250 = vmatprep.subr.bf16.mxu1 %v2249_v60  ;;  %v577_v51 = vld [vmem:[#allocation5 + $0x3d0] sm:$0xff]  ;;  %v518_v53 = vld [vmem:[#allocation5 + $0x1f8] sm:$0xff]  ;;  %v580_v54 = vld [vmem:[#allocation5 + $0x3e8] sm:$0xff]  ;;  %v2267_v56 = vpack.c.bf16 %v513_v48, %v511_v47 }
  0xaa   : > { %2312 = vmatpush1.bf16.msra.mxu0 %v2311_v59  ;;  %v582_v55 = vld [vmem:[#allocation5 + $0x3f8] sm:$0xff]  ;;  %v2331_v57 = vpack.c.bf16 %v577_v51, %v575_v49  ;;  %v2269_v58 = vpack.c.bf16 %v518_v53, %v516_v52  ;;  %v515_v59 = vld [vmem:[#allocation5 + $0x1e0] sm:$0xff]  ;;  %v517_v60 = vld [vmem:[#allocation5 + $0x1f0] sm:$0xff] }
  0xab   : > { %2314 = vmatprep.subr.bf16.mxu0 %v2313_v0  ;;  %v2333_v61 = vpack.c.bf16 %v582_v55, %v580_v54  ;;  %v579_v62 = vld [vmem:[#allocation5 + $0x3e0] sm:$0xff]  ;;  %v581_v63 = vld [vmem:[#allocation5 + $0x3f0] sm:$0xff]  ;;  %v2271_v0 = vpack.c.bf16 %v517_v60, %v515_v59  ;;  %v332_v4 = vld [vmem:[%s2990_s19 + $0x28] sm:$0xff] }
  0xac   : > { %2252 = vmatpush1.bf16.msra.mxu1 %v2251_v6  ;;  %v2335_v1 = vpack.c.bf16 %v581_v63, %v579_v62  ;;  %v327_v2 = vld [vmem:[%s2990_s19] sm:$0xff]  ;;  %v329_v3 = vld [vmem:[%s2990_s19 + $0x10] sm:$0xff]  ;;  %v334_v5 = vld [vmem:[%s2990_s19 + $0x38] sm:$0xff] }
  0xad   : > { %2254 = vmatprep.subr.bf16.mxu1 %v2253_v9  ;;  %v331_v6 = vld [vmem:[%s2990_s19 + $0x20] sm:$0xff]  ;;  %v333_v7 = vld [vmem:[%s2990_s19 + $0x30] sm:$0xff]  ;;  %v338_v9 = vld [vmem:[%s2990_s19 + $0x58] sm:$0xff] }
  0xae   : > { %2316 = vmatpush1.bf16.msra.mxu0 %v2315_v8  ;;  %v336_v8 = vld [vmem:[%s2990_s19 + $0x48] sm:$0xff]  ;;  %v335_v10 = vld [vmem:[%s2990_s19 + $0x40] sm:$0xff]  ;;  %v337_v11 = vld [vmem:[%s2990_s19 + $0x50] sm:$0xff] }
  0xaf   : > { %2318 = vmatprep.subr.bf16.mxu0 %v2317_v13  ;;  %v340_v12 = vld [vmem:[%s2990_s19 + $0x68] sm:$0xff]  ;;  %v342_v13 = vld [vmem:[%s2990_s19 + $0x78] sm:$0xff]  ;;  %v339_v14 = vld [vmem:[%s2990_s19 + $0x60] sm:$0xff] }
  0xb0   : > { %2256 = vmatpush1.bf16.msra.mxu1 %v2255_v20  ;;  %v341_v15 = vld [vmem:[%s2990_s19 + $0x70] sm:$0xff]  ;;  %v344_v16 = vld [vmem:[%s2990_s19 + $0x88] sm:$0xff]  ;;  %v346_v17 = vld [vmem:[%s2990_s19 + $0x98] sm:$0xff] }
  0xb1   : > { %2258 = vmatprep.subr.bf16.mxu1 %v2257_v22  ;;  %v343_v18 = vld [vmem:[%s2990_s19 + $0x80] sm:$0xff]  ;;  %v345_v19 = vld [vmem:[%s2990_s19 + $0x90] sm:$0xff]  ;;  %v348_v20 = vld [vmem:[%s2990_s19 + $0xa8] sm:$0xff] }
  0xb2   : > { %2320 = vmatpush1.bf16.msra.mxu0 %v2319_v21  ;;  %v350_v21 = vld [vmem:[%s2990_s19 + $0xb8] sm:$0xff]  ;;  %v347_v22 = vld [vmem:[%s2990_s19 + $0xa0] sm:$0xff]  ;;  %v349_v23 = vld [vmem:[%s2990_s19 + $0xb0] sm:$0xff] }
  0xb3   : > { %2322 = vmatprep.subr.bf16.mxu0 %v2321_v26  ;;  %v352_v24 = vld [vmem:[%s2990_s19 + $0xc8] sm:$0xff]  ;;  %v354_v25 = vld [vmem:[%s2990_s19 + $0xd8] sm:$0xff]  ;;  %v351_v26 = vld [vmem:[%s2990_s19 + $0xc0] sm:$0xff] }
  0xb4   : > { %2260 = vmatpush1.bf16.msra.mxu1 %v2259_v32  ;;  %v353_v27 = vld [vmem:[%s2990_s19 + $0xd0] sm:$0xff]  ;;  %v356_v28 = vld [vmem:[%s2990_s19 + $0xe8] sm:$0xff]  ;;  %v358_v29 = vld [vmem:[%s2990_s19 + $0xf8] sm:$0xff] }
  0xb5   : > { %2262 = vmatprep.subr.bf16.mxu1 %v2261_v34  ;;  %v355_v30 = vld [vmem:[%s2990_s19 + $0xe0] sm:$0xff]  ;;  %v357_v31 = vld [vmem:[%s2990_s19 + $0xf0] sm:$0xff]  ;;  %v360_v32 = vld [vmem:[%s2990_s19 + $0x108] sm:$0xff] }
  0xb6   : > { %2324 = vmatpush1.bf16.msra.mxu0 %v2323_v33  ;;  %v362_v33 = vld [vmem:[%s2990_s19 + $0x118] sm:$0xff]  ;;  %v359_v34 = vld [vmem:[%s2990_s19 + $0x100] sm:$0xff]  ;;  %v361_v35 = vld [vmem:[%s2990_s19 + $0x110] sm:$0xff] }
  0xb7   : > { %2326 = vmatprep.subr.bf16.mxu0 %v2325_v38  ;;  %v364_v36 = vld [vmem:[%s2990_s19 + $0x128] sm:$0xff]  ;;  %v366_v37 = vld [vmem:[%s2990_s19 + $0x138] sm:$0xff]  ;;  %v363_v38 = vld [vmem:[%s2990_s19 + $0x120] sm:$0xff] }
  0xb8   : > { %2264 = vmatpush1.bf16.msra.mxu1 %v2263_v44  ;;  %v365_v39 = vld [vmem:[%s2990_s19 + $0x130] sm:$0xff]  ;;  %v368_v40 = vld [vmem:[%s2990_s19 + $0x148] sm:$0xff]  ;;  %v370_v41 = vld [vmem:[%s2990_s19 + $0x158] sm:$0xff] }
  0xb9   : > { %2266 = vmatprep.subr.bf16.mxu1 %v2265_v46  ;;  %v367_v42 = vld [vmem:[%s2990_s19 + $0x140] sm:$0xff]  ;;  %v369_v43 = vld [vmem:[%s2990_s19 + $0x150] sm:$0xff]  ;;  %v372_v44 = vld [vmem:[%s2990_s19 + $0x168] sm:$0xff] }
  0xba   : > { %2328 = vmatpush1.bf16.msra.mxu0 %v2327_v45  ;;  %v374_v45 = vld [vmem:[%s2990_s19 + $0x178] sm:$0xff]  ;;  %v371_v46 = vld [vmem:[%s2990_s19 + $0x160] sm:$0xff]  ;;  %v373_v47 = vld [vmem:[%s2990_s19 + $0x170] sm:$0xff] }
  0xbb   : > { %2330 = vmatprep.subr.bf16.mxu0 %v2329_v50  ;;  %v376_v48 = vld [vmem:[%s2990_s19 + $0x188] sm:$0xff]  ;;  %v378_v49 = vld [vmem:[%s2990_s19 + $0x198] sm:$0xff]  ;;  %v375_v50 = vld [vmem:[%s2990_s19 + $0x180] sm:$0xff] }
  0xbc   : > { %2268 = vmatpush1.bf16.msra.mxu1 %v2267_v56  ;;  %v377_v51 = vld [vmem:[%s2990_s19 + $0x190] sm:$0xff]  ;;  %v380_v52 = vld [vmem:[%s2990_s19 + $0x1a8] sm:$0xff]  ;;  %v382_v53 = vld [vmem:[%s2990_s19 + $0x1b8] sm:$0xff] }
  0xbd   : > { %2270 = vmatprep.subr.bf16.mxu1 %v2269_v58  ;;  %v379_v54 = vld [vmem:[%s2990_s19 + $0x1a0] sm:$0xff]  ;;  %v381_v55 = vld [vmem:[%s2990_s19 + $0x1b0] sm:$0xff]  ;;  %v384_v56 = vld [vmem:[%s2990_s19 + $0x1c8] sm:$0xff] }
  0xbe   : > { %2332 = vmatpush1.bf16.msra.mxu0 %v2331_v57  ;;  %v386_v57 = vld [vmem:[%s2990_s19 + $0x1d8] sm:$0xff]  ;;  %v383_v58 = vld [vmem:[%s2990_s19 + $0x1c0] sm:$0xff]  ;;  %v385_v59 = vld [vmem:[%s2990_s19 + $0x1d0] sm:$0xff] }
  0xbf   : > { %2334 = vmatprep.subr.bf16.mxu0 %v2333_v61  ;;  %v388_v60 = vld [vmem:[%s2990_s19 + $0x1e8] sm:$0xff]  ;;  %v390_v61 = vld [vmem:[%s2990_s19 + $0x1f8] sm:$0xff]  ;;  %v387_v62 = vld [vmem:[%s2990_s19 + $0x1e0] sm:$0xff] }
  0xc0   : > { %2272 = vmatpush1.bf16.msra.mxu1 %v2271_v0  ;;  %v389_v63 = vld [vmem:[%s2990_s19 + $0x1f0] sm:$0xff]  ;;  %v392_v0 = vld [vmem:[%s2990_s19 + $0x208] sm:$0xff] }
  0xc2   : > { %2336 = vmatpush1.bf16.msra.mxu0 %v2335_v1  ;;  %v394_v1 = vld [vmem:[%s2990_s19 + $0x218] sm:$0xff] }
  0xc3   : > { %660 = vmatmul.mubr.f32.vlgmr.msra.gmra.mrb[0].mxu1 %v327_v2  ;;  %v391_v2 = vld [vmem:[%s2990_s19 + $0x200] sm:$0xff] }
  0xc4   : > { %665 = vmatprep.mubr.f32.mxu1 %v332_v4  ;;  %v396_v4 = vld [vmem:[%s2990_s19 + $0x228] sm:$0xff] }
  0xc5   : > { %917 = vmatmul.mubr.f32.vlgmr.msra.gmra.mrb[0].mxu0 %v329_v3  ;;  %v393_v3 = vld [vmem:[%s2990_s19 + $0x210] sm:$0xff] }
  0xc6   : > { %922 = vmatprep.mubr.f32.mxu0 %v334_v5  ;;  %v398_v5 = vld [vmem:[%s2990_s19 + $0x238] sm:$0xff] }
  0xc7   : > { %666 = vmatmul.mubr.f32.gmra.mrb[2].mxu1 %v331_v6  ;;  %v395_v6 = vld [vmem:[%s2990_s19 + $0x220] sm:$0xff] }
  0xc8   : > { %671 = vmatprep.mubr.f32.mxu1 %v336_v8  ;;  %v400_v8 = vld [vmem:[%s2990_s19 + $0x248] sm:$0xff] }
  0xc9   : > { %923 = vmatmul.mubr.f32.gmra.mrb[2].mxu0 %v333_v7  ;;  %v397_v7 = vld [vmem:[%s2990_s19 + $0x230] sm:$0xff] }
  0xca   : > { %928 = vmatprep.mubr.f32.mxu0 %v338_v9  ;;  %v402_v9 = vld [vmem:[%s2990_s19 + $0x258] sm:$0xff] }
  0xcb   : > { %672 = vmatmul.mubr.f32.gmra.mrb[4].mxu1 %v335_v10  ;;  %v399_v10 = vld [vmem:[%s2990_s19 + $0x240] sm:$0xff] }
  0xcc   : > { %677 = vmatprep.mubr.f32.mxu1 %v340_v12  ;;  %v404_v12 = vld [vmem:[%s2990_s19 + $0x268] sm:$0xff] }
  0xcd   : > { %929 = vmatmul.mubr.f32.gmra.mrb[4].mxu0 %v337_v11  ;;  %v401_v11 = vld [vmem:[%s2990_s19 + $0x250] sm:$0xff] }
  0xce   : > { %934 = vmatprep.mubr.f32.mxu0 %v342_v13  ;;  %v406_v13 = vld [vmem:[%s2990_s19 + $0x278] sm:$0xff] }
  0xcf   : > { %678 = vmatmul.mubr.f32.gmra.mrb[6].mxu1 %v339_v14  ;;  %v403_v14 = vld [vmem:[%s2990_s19 + $0x260] sm:$0xff] }
  0xd0   : > { %683 = vmatprep.mubr.f32.mxu1 %v344_v16  ;;  %v408_v16 = vld [vmem:[%s2990_s19 + $0x288] sm:$0xff] }
  0xd1   : > { %935 = vmatmul.mubr.f32.gmra.mrb[6].mxu0 %v341_v15  ;;  %v405_v15 = vld [vmem:[%s2990_s19 + $0x270] sm:$0xff] }
  0xd2   : > { %940 = vmatprep.mubr.f32.mxu0 %v346_v17  ;;  %v410_v17 = vld [vmem:[%s2990_s19 + $0x298] sm:$0xff] }
  0xd3   : > { %684 = vmatmul.mubr.f32.gmra.mrb[8].mxu1 %v343_v18  ;;  %v407_v18 = vld [vmem:[%s2990_s19 + $0x280] sm:$0xff] }
  0xd4   : > { %689 = vmatprep.mubr.f32.mxu1 %v348_v20  ;;  %v412_v20 = vld [vmem:[%s2990_s19 + $0x2a8] sm:$0xff] }
  0xd5   : > { %941 = vmatmul.mubr.f32.gmra.mrb[8].mxu0 %v345_v19  ;;  %v409_v19 = vld [vmem:[%s2990_s19 + $0x290] sm:$0xff] }
  0xd6   : > { %946 = vmatprep.mubr.f32.mxu0 %v350_v21  ;;  %v414_v21 = vld [vmem:[%s2990_s19 + $0x2b8] sm:$0xff] }
  0xd7   : > { %690 = vmatmul.mubr.f32.gmra.mrb[10].mxu1 %v347_v22  ;;  %v411_v22 = vld [vmem:[%s2990_s19 + $0x2a0] sm:$0xff] }
  0xd8   : > { %695 = vmatprep.mubr.f32.mxu1 %v352_v24  ;;  %v416_v24 = vld [vmem:[%s2990_s19 + $0x2c8] sm:$0xff] }
  0xd9   : > { %947 = vmatmul.mubr.f32.gmra.mrb[10].mxu0 %v349_v23  ;;  %v413_v23 = vld [vmem:[%s2990_s19 + $0x2b0] sm:$0xff] }
  0xda   : > { %952 = vmatprep.mubr.f32.mxu0 %v354_v25  ;;  %v418_v25 = vld [vmem:[%s2990_s19 + $0x2d8] sm:$0xff] }
  0xdb   : > { %696 = vmatmul.mubr.f32.gmra.mrb[12].mxu1 %v351_v26  ;;  %v415_v26 = vld [vmem:[%s2990_s19 + $0x2c0] sm:$0xff] }
  0xdc   : > { %701 = vmatprep.mubr.f32.mxu1 %v356_v28  ;;  %v420_v28 = vld [vmem:[%s2990_s19 + $0x2e8] sm:$0xff] }
  0xdd   : > { %953 = vmatmul.mubr.f32.gmra.mrb[12].mxu0 %v353_v27  ;;  %v417_v27 = vld [vmem:[%s2990_s19 + $0x2d0] sm:$0xff] }
  0xde   : > { %958 = vmatprep.mubr.f32.mxu0 %v358_v29  ;;  %v422_v29 = vld [vmem:[%s2990_s19 + $0x2f8] sm:$0xff] }
  0xdf   : > { %702 = vmatmul.mubr.f32.gmra.mrb[14].mxu1 %v355_v30  ;;  %v419_v30 = vld [vmem:[%s2990_s19 + $0x2e0] sm:$0xff] }
  0xe0   : > { %707 = vmatprep.mubr.f32.mxu1 %v360_v32  ;;  %v424_v32 = vld [vmem:[%s2990_s19 + $0x308] sm:$0xff] }
  0xe1   : > { %959 = vmatmul.mubr.f32.gmra.mrb[14].mxu0 %v357_v31  ;;  %v421_v31 = vld [vmem:[%s2990_s19 + $0x2f0] sm:$0xff] }
  0xe2   : > { %964 = vmatprep.mubr.f32.mxu0 %v362_v33  ;;  %v426_v33 = vld [vmem:[%s2990_s19 + $0x318] sm:$0xff] }
  0xe3   : > { %708 = vmatmul.mubr.f32.gmra.mrb[16].mxu1 %v359_v34  ;;  %v423_v34 = vld [vmem:[%s2990_s19 + $0x300] sm:$0xff] }
  0xe4   : > { %713 = vmatprep.mubr.f32.mxu1 %v364_v36  ;;  %v428_v36 = vld [vmem:[%s2990_s19 + $0x328] sm:$0xff] }
  0xe5   : > { %965 = vmatmul.mubr.f32.gmra.mrb[16].mxu0 %v361_v35  ;;  %v425_v35 = vld [vmem:[%s2990_s19 + $0x310] sm:$0xff] }
  0xe6   : > { %970 = vmatprep.mubr.f32.mxu0 %v366_v37  ;;  %v430_v37 = vld [vmem:[%s2990_s19 + $0x338] sm:$0xff] }
  0xe7   : > { %714 = vmatmul.mubr.f32.gmra.mrb[18].mxu1 %v363_v38  ;;  %v427_v38 = vld [vmem:[%s2990_s19 + $0x320] sm:$0xff] }
  0xe8   : > { %719 = vmatprep.mubr.f32.mxu1 %v368_v40  ;;  %v432_v40 = vld [vmem:[%s2990_s19 + $0x348] sm:$0xff] }
  0xe9   : > { %971 = vmatmul.mubr.f32.gmra.mrb[18].mxu0 %v365_v39  ;;  %v429_v39 = vld [vmem:[%s2990_s19 + $0x330] sm:$0xff] }
  0xea   : > { %976 = vmatprep.mubr.f32.mxu0 %v370_v41  ;;  %v434_v41 = vld [vmem:[%s2990_s19 + $0x358] sm:$0xff] }
  0xeb   : > { %720 = vmatmul.mubr.f32.gmra.mrb[20].mxu1 %v367_v42  ;;  %v431_v42 = vld [vmem:[%s2990_s19 + $0x340] sm:$0xff] }
  0xec   : > { %725 = vmatprep.mubr.f32.mxu1 %v372_v44  ;;  %v436_v44 = vld [vmem:[%s2990_s19 + $0x368] sm:$0xff] }
  0xed   : > { %977 = vmatmul.mubr.f32.gmra.mrb[20].mxu0 %v369_v43  ;;  %v433_v43 = vld [vmem:[%s2990_s19 + $0x350] sm:$0xff] }
  0xee   : > { %982 = vmatprep.mubr.f32.mxu0 %v374_v45  ;;  %v438_v45 = vld [vmem:[%s2990_s19 + $0x378] sm:$0xff] }
  0xef   : > { %726 = vmatmul.mubr.f32.gmra.mrb[22].mxu1 %v371_v46  ;;  %v435_v46 = vld [vmem:[%s2990_s19 + $0x360] sm:$0xff] }
  0xf0   : > { %731 = vmatprep.mubr.f32.mxu1 %v376_v48  ;;  %v440_v48 = vld [vmem:[%s2990_s19 + $0x388] sm:$0xff] }
  0xf1   : > { %983 = vmatmul.mubr.f32.gmra.mrb[22].mxu0 %v373_v47  ;;  %v437_v47 = vld [vmem:[%s2990_s19 + $0x370] sm:$0xff] }
  0xf2   : > { %988 = vmatprep.mubr.f32.mxu0 %v378_v49  ;;  %v442_v49 = vld [vmem:[%s2990_s19 + $0x398] sm:$0xff] }
  0xf3   : > { %732 = vmatmul.mubr.f32.gmra.mrb[24].mxu1 %v375_v50  ;;  %v439_v50 = vld [vmem:[%s2990_s19 + $0x380] sm:$0xff] }
  0xf4   : > { %737 = vmatprep.mubr.f32.mxu1 %v380_v52  ;;  %v444_v52 = vld [vmem:[%s2990_s19 + $0x3a8] sm:$0xff] }
  0xf5   : > { %989 = vmatmul.mubr.f32.gmra.mrb[24].mxu0 %v377_v51  ;;  %v441_v51 = vld [vmem:[%s2990_s19 + $0x390] sm:$0xff] }
  0xf6   : > { %994 = vmatprep.mubr.f32.mxu0 %v382_v53  ;;  %v446_v53 = vld [vmem:[%s2990_s19 + $0x3b8] sm:$0xff] }
  0xf7   : > { %738 = vmatmul.mubr.f32.gmra.mrb[26].mxu1 %v379_v54  ;;  %v443_v54 = vld [vmem:[%s2990_s19 + $0x3a0] sm:$0xff] }
  0xf8   : > { %743 = vmatprep.mubr.f32.mxu1 %v384_v56  ;;  %v448_v56 = vld [vmem:[%s2990_s19 + $0x3c8] sm:$0xff] }
  0xf9   : > { %995 = vmatmul.mubr.f32.gmra.mrb[26].mxu0 %v381_v55  ;;  %v445_v55 = vld [vmem:[%s2990_s19 + $0x3b0] sm:$0xff] }
  0xfa   : > { %1000 = vmatprep.mubr.f32.mxu0 %v386_v57  ;;  %v450_v57 = vld [vmem:[%s2990_s19 + $0x3d8] sm:$0xff] }
  0xfb   : > { %744 = vmatmul.mubr.f32.gmra.mrb[28].mxu1 %v383_v58  ;;  %v447_v58 = vld [vmem:[%s2990_s19 + $0x3c0] sm:$0xff] }
  0xfc   : > { %749 = vmatprep.mubr.f32.mxu1 %v388_v60  ;;  %v452_v60 = vld [vmem:[%s2990_s19 + $0x3e8] sm:$0xff] }
  0xfd   : > { %1001 = vmatmul.mubr.f32.gmra.mrb[28].mxu0 %v385_v59  ;;  %v449_v59 = vld [vmem:[%s2990_s19 + $0x3d0] sm:$0xff] }
  0xfe   : > { %1006 = vmatprep.mubr.f32.mxu0 %v390_v61  ;;  %v454_v61 = vld [vmem:[%s2990_s19 + $0x3f8] sm:$0xff] }
  0xff   : > { %750 = vmatmul.mubr.f32.gmra.mrb[30].mxu1 %v387_v62  ;;  %v451_v62 = vld [vmem:[%s2990_s19 + $0x3e0] sm:$0xff] }
 0x100   : > { %755 = vmatprep.mubr.f32.mxu1 %v392_v0  ;;  %v585_v0 = vlaneseq }
 0x101   : > { %1007 = vmatmul.mubr.f32.gmra.mrb[30].mxu0 %v389_v63  ;;  %v453_v63 = vld [vmem:[%s2990_s19 + $0x3f0] sm:$0xff]  ;;  %s2689_s19 = sshll.u32 %s2768_s16, 4  ;;  %s2690_s19 = int_to_ptr.vmem [resolvable:$false] %s2689_s19 }
 0x102   : > { %1012 = vmatprep.mubr.f32.mxu0 %v394_v1  ;;  %v586_v1 = vshrl.u32 %v585_v0, 7  ;;  %s2691_s20 = scalar_lea.vmem %s2690_s19, 16384  ;;  %p2692_p13 = scmp.lt.s32.totalorder %s4065_s14, %s2690_s19 }
 0x103   : > { %756 = vmatmul.mubr.f32.gmra.mrb[32].mxu1 %v391_v2  ;;  %p2693_p3 = scmp.lt.s32.totalorder %s2691_s20, %s2685_s0 }
 0x104   : > { %761 = vmatprep.mubr.f32.mxu1 %v396_v4  ;;  %v3137_v2 = vsub.s32 0, %v586_v1  ;;  %v3142_v4 = vsub.s32 1, %v586_v1 }
 0x105   : > { %1013 = vmatmul.mubr.f32.gmra.mrb[32].mxu0 %v393_v3  ;;  %v583_v3 = vld [vmem:[%s4115_s2] sm:$0x3]  ;;  %p2694_p1 = por %p2693_p3, %p2692_p13 }
 0x106   : > { %1018 = vmatprep.mubr.f32.mxu0 %v398_v5  ;;  %v3145_v5 = vrot.slane %v583_v3, %v3137_v2 }
 0x107   : > { %762 = vmatmul.mubr.f32.gmra.mrb[34].mxu1 %v395_v6  ;;  %v3148_v6 = vrot.slane %v583_v3, %v3142_v4  ;;  %p2695_p4 = pnand %p2694_p1, %p2688_p6 }
 0x108   : > { %767 = vmatprep.mubr.f32.mxu1 %v400_v8 }
 0x109   : > { %1019 = vmatmul.mubr.f32.gmra.mrb[34].mxu0 %v397_v7 }
 0x10a   : > { %1024 = vmatprep.mubr.f32.mxu0 %v402_v9 }
 0x10b   : > { %768 = vmatmul.mubr.f32.gmra.mrb[36].mxu1 %v399_v10 }
 0x10c   : > { %773 = vmatprep.mubr.f32.mxu1 %v404_v12  ;;  %v1109_v12 = vld [vmem:[%s3003_s27] sm:$0xff] }
 0x10d   : > { %1025 = vmatmul.mubr.f32.gmra.mrb[36].mxu0 %v401_v11 }
 0x10e   : > { %1030 = vmatprep.mubr.f32.mxu0 %v406_v13 }
 0x10f   : > { %774 = vmatmul.mubr.f32.gmra.mrb[38].mxu1 %v403_v14 }
 0x110   : > { %779 = vmatprep.mubr.f32.mxu1 %v408_v16 }
 0x111   : > { %1031 = vmatmul.mubr.f32.gmra.mrb[38].mxu0 %v405_v15  ;;  %v1110_v15 = vld [vmem:[%s3003_s27 + $0x8] sm:$0xff] }
 0x112   : > { %1036 = vmatprep.mubr.f32.mxu0 %v410_v17 }
 0x113   : > { %780 = vmatmul.mubr.f32.gmra.mrb[40].mxu1 %v407_v18 }
 0x114   : > { %785 = vmatprep.mubr.f32.mxu1 %v412_v20 }
 0x115   : > { %1037 = vmatmul.mubr.f32.gmra.mrb[40].mxu0 %v409_v19 }
 0x116   : > { %1042 = vmatprep.mubr.f32.mxu0 %v414_v21 }
 0x117   : > { %786 = vmatmul.mubr.f32.gmra.mrb[42].mxu1 %v411_v22 }
 0x118   : > { %791 = vmatprep.mubr.f32.mxu1 %v416_v24  ;;  %v1111_v24 = vld [vmem:[%s3003_s27 + $0x10] sm:$0xff] }
 0x119   : > { %1043 = vmatmul.mubr.f32.gmra.mrb[42].mxu0 %v413_v23 }
 0x11a   : > { %1048 = vmatprep.mubr.f32.mxu0 %v418_v25 }
 0x11b   : > { %792 = vmatmul.mubr.f32.gmra.mrb[44].mxu1 %v415_v26 }
 0x11c   : > { %797 = vmatprep.mubr.f32.mxu1 %v420_v28 }
 0x11d   : > { %1049 = vmatmul.mubr.f32.gmra.mrb[44].mxu0 %v417_v27  ;;  %v1112_v27 = vld [vmem:[%s3003_s27 + $0x18] sm:$0xff] }
 0x11e   : > { %1054 = vmatprep.mubr.f32.mxu0 %v422_v29 }
 0x11f   : > { %798 = vmatmul.mubr.f32.gmra.mrb[46].mxu1 %v419_v30 }
 0x120   : > { %803 = vmatprep.mubr.f32.mxu1 %v424_v32 }
 0x121   : > { %1055 = vmatmul.mubr.f32.gmra.mrb[46].mxu0 %v421_v31 }
 0x122   : > { %1060 = vmatprep.mubr.f32.mxu0 %v426_v33 }
 0x123   : > { %804 = vmatmul.mubr.f32.gmra.mrb[48].mxu1 %v423_v34 }
 0x124   : > { %809 = vmatprep.mubr.f32.mxu1 %v428_v36 }
 0x125   : > { %1061 = vmatmul.mubr.f32.gmra.mrb[48].mxu0 %v425_v35 }
 0x126   : > { %1066 = vmatprep.mubr.f32.mxu0 %v430_v37 }
 0x127   : > { %810 = vmatmul.mubr.f32.gmra.mrb[50].mxu1 %v427_v38 }
 0x128   : > { %815 = vmatprep.mubr.f32.mxu1 %v432_v40 }
 0x129   : > { %1067 = vmatmul.mubr.f32.gmra.mrb[50].mxu0 %v429_v39  ;;  %v1113_v39 = vld [vmem:[%s3003_s27 + $0x20] sm:$0xff] }
 0x12a   : > { %1072 = vmatprep.mubr.f32.mxu0 %v434_v41 }
 0x12b   : > { %816 = vmatmul.mubr.f32.gmra.mrb[52].mxu1 %v431_v42  ;;  %v1114_v42 = vld [vmem:[%s3003_s27 + $0x28] sm:$0xff] }
 0x12c   : > { %821 = vmatprep.mubr.f32.mxu1 %v436_v44 }
 0x12d   : > { %1073 = vmatmul.mubr.f32.gmra.mrb[52].mxu0 %v433_v43 }
 0x12e   : > { %1078 = vmatprep.mubr.f32.mxu0 %v438_v45 }
 0x12f   : > { %822 = vmatmul.mubr.f32.gmra.mrb[54].mxu1 %v435_v46 }
 0x130   : > { %827 = vmatprep.mubr.f32.mxu1 %v440_v48 }
 0x131   : > { %1079 = vmatmul.mubr.f32.gmra.mrb[54].mxu0 %v437_v47 }
 0x132   : > { %1084 = vmatprep.mubr.f32.mxu0 %v442_v49 }
 0x133   : > { %828 = vmatmul.mubr.f32.gmra.mrb[56].mxu1 %v439_v50 }
 0x134   : > { %833 = vmatprep.mubr.f32.mxu1 %v444_v52 }
 0x135   : > { %1085 = vmatmul.mubr.f32.gmra.mrb[56].mxu0 %v441_v51 }
 0x136   : > { %1090 = vmatprep.mubr.f32.mxu0 %v446_v53 }
 0x137   : > { %834 = vmatmul.mubr.f32.gmra.mrb[58].mxu1 %v443_v54  ;;  %v1115_v54 = vld [vmem:[%s3003_s27 + $0x30] sm:$0xff] }
 0x138   : > { %839 = vmatprep.mubr.f32.mxu1 %v448_v56 }
 0x139   : > { %1091 = vmatmul.mubr.f32.gmra.mrb[58].mxu0 %v445_v55 }
 0x13a   : > { %1096 = vmatprep.mubr.f32.mxu0 %v450_v57 }
 0x13b   : > { %840 = vmatmul.mubr.f32.gmra.mrb[60].mxu1 %v447_v58  ;;  %v1116_v58 = vld [vmem:[%s3003_s27 + $0x38] sm:$0xff] }
 0x13c   : > { %845 = vmatprep.mubr.f32.mxu1 %v452_v60 }
 0x13d   : > { %1097 = vmatmul.mubr.f32.gmra.mrb[60].mxu0 %v449_v59 }
 0x13e   : > { %1102 = vmatprep.mubr.f32.mxu0 %v454_v61 }
 0x13f   : > { %846 = vmatmul.mubr.f32.gmra.mrb[62].mxu1 %v451_v62 }
 0x141   : > { %1103 = vmatmul.mubr.f32.gmra.mrb[62].mxu0 %v453_v63 }
 0x196   : > { %v661_v7 = vpop.f32.mrb[0].mxu1 }
 0x197   : > { %v662_v8 = vadd.f32 %v661_v7, %v3145_v5  ;;  %v663_v9 = vpop.f32.mrb[1].mxu1 }
 0x198   : > { %v918_v10 = vpop.f32.mrb[0].mxu0  ;;  %v664_v11 = vadd.f32 %v663_v9, %v3148_v6 }
 0x199   : > { %v920_v13 = vpop.f32.mrb[1].mxu0  ;;  %v919_v14 = vadd.f32 %v918_v10, %v662_v8 }
 0x19a   : > { %v921_v16 = vadd.f32 %v920_v13, %v664_v11  ;;  %v667_v17 = vpop.f32.mrb[2].mxu1  ;;  %v1117_v11 = vld [vmem:[%s3003_s27 + $0x40] sm:$0xff] }
 0x19b   : > { %v3154_v18 = vadd.f32 %v1109_v12, %v919_v14  ;;  %v668_v19 = vadd.f32 %v667_v17, %v3145_v5  ;;  %v669_v20 = vpop.f32.mrb[3].mxu1 }
 0x19c   : > { %v924_v21 = vpop.f32.mrb[2].mxu0  ;;  %v3157_v22 = vadd.f32 %v1110_v15, %v921_v16  ;;  %v670_v23 = vadd.f32 %v669_v20, %v3148_v6  ;;  %v1118_v15 = vld [vmem:[%s3003_s27 + $0x48] sm:$0xff] }
 0x19d   : > { %v926_v25 = vpop.f32.mrb[3].mxu0  ;;  %v925_v26 = vadd.f32 %v924_v21, %v668_v19  ;;  %v1366_v31 = vmul.f32 %v3154_v18, %v3154_v18 }
 0x19e   : > { %v927_v28 = vadd.f32 %v926_v25, %v670_v23  ;;  %v673_v29 = vpop.f32.mrb[4].mxu1  ;;  %v1237_v30 = vadd.f32 %v3157_v22, %v3154_v18  ;;  %v1367_v32 = vmul.f32 %v3157_v22, %v3157_v22 }
 0x19f   : > { %v3168_v33 = vadd.f32 %v1111_v24, %v925_v26  ;;  %v674_v34 = vadd.f32 %v673_v29, %v3145_v5  ;;  %v675_v35 = vpop.f32.mrb[5].mxu1 }
 0x1a0   : > { %v930_v36 = vpop.f32.mrb[4].mxu0  ;;  %v3171_v37 = vadd.f32 %v1112_v27, %v927_v28  ;;  %v676_v38 = vadd.f32 %v675_v35, %v3148_v6  ;;  %1238 = vadd.xlane.f32.xlu0 %v1237_v30  ;;  %v1430_v46 = vadd.f32 %v1367_v32, %v1366_v31  ;;  %v1119_v27 = vld [vmem:[%s3003_s27 + $0x50] sm:$0xff]  ;;  %v1120_v32 = vld [vmem:[%s3003_s27 + $0x58] sm:$0xff] }
 0x1a1   : > { %v932_v40 = vpop.f32.mrb[5].mxu0  ;;  %v931_v41 = vadd.f32 %v930_v36, %v674_v34  ;;  %v1368_v43 = vmul.f32 %v3168_v33, %v3168_v33 }
 0x1a2   : > { %v933_v44 = vadd.f32 %v932_v40, %v676_v38  ;;  %v679_v45 = vpop.f32.mrb[6].mxu1  ;;  %v1369_v47 = vmul.f32 %v3171_v37, %v3171_v37  ;;  %v1240_v62 = vadd.f32 %v3171_v37, %v3168_v33 }
 0x1a3   : > { %v3180_v48 = vadd.f32 %v1113_v39, %v931_v41  ;;  %v680_v49 = vadd.f32 %v679_v45, %v3145_v5  ;;  %v681_v50 = vpop.f32.mrb[7].mxu1 }
 0x1a4   : > { %v936_v51 = vpop.f32.mrb[6].mxu0  ;;  %v3183_v52 = vadd.f32 %v1114_v42, %v933_v44  ;;  %v682_v53 = vadd.f32 %v681_v50, %v3148_v6  ;;  %1431 = vadd.xlane.f32.xlu0 %v1430_v46  ;;  %v1433_v56 = vadd.f32 %v1369_v47, %v1368_v43  ;;  %v1121_v46 = vld [vmem:[%s3003_s27 + $0x60] sm:$0xff] }
 0x1a5   : > { %v938_v55 = vpop.f32.mrb[7].mxu0  ;;  %v937_v57 = vadd.f32 %v936_v51, %v680_v49  ;;  %v1370_v59 = vmul.f32 %v3180_v48, %v3180_v48 }
 0x1a6   : > { %v685_v60 = vpop.f32.mrb[8].mxu1  ;;  %v939_v61 = vadd.f32 %v938_v55, %v682_v53  ;;  %1434 = vadd.xlane.f32.xlu1 %v1433_v56  ;;  %v1243_v63 = vadd.f32 %v3183_v52, %v3180_v48  ;;  %v1371_v0 = vmul.f32 %v3183_v52, %v3183_v52  ;;  %v1122_v53 = vld [vmem:[%s3003_s27 + $0x68] sm:$0xff] }
 0x1a7   : > { %v3196_v1 = vadd.f32 %v1115_v54, %v937_v57  ;;  %v686_v3 = vadd.f32 %v685_v60, %v3145_v5  ;;  %v687_v7 = vpop.f32.mrb[9].mxu1 }
 0x1a8   : > { %v942_v8 = vpop.f32.mrb[8].mxu0  ;;  %v3199_v9 = vadd.f32 %v1116_v58, %v939_v61  ;;  %v688_v10 = vadd.f32 %v687_v7, %v3148_v6  ;;  %1241 = vadd.xlane.f32.xlu0 %v1240_v62  ;;  %v1436_v13 = vadd.f32 %v1371_v0, %v1370_v59 }
 0x1a9   : > { %v944_v12 = vpop.f32.mrb[9].mxu0  ;;  %v943_v14 = vadd.f32 %v942_v8, %v686_v3  ;;  %v1372_v29 = vmul.f32 %v3196_v1, %v3196_v1 }
 0x1aa   : > { %v945_v16 = vadd.f32 %v944_v12, %v688_v10  ;;  %1244 = vadd.xlane.f32.xlu1 %v1243_v63  ;;  %v691_v17 = vpop.f32.mrb[10].mxu1  ;;  %v1246_v19 = vadd.f32 %v3199_v9, %v3196_v1  ;;  %v1373_v30 = vmul.f32 %v3199_v9, %v3199_v9  ;;  %v1123_v63 = vld [vmem:[%s3003_s27 + $0x70] sm:$0xff]  ;;  %v1124_v10 = vld [vmem:[%s3003_s27 + $0x78] sm:$0xff] }
 0x1ab   : > { %v3206_v20 = vadd.f32 %v1117_v11, %v943_v14  ;;  %v692_v21 = vadd.f32 %v691_v17, %v3145_v5  ;;  %v693_v23 = vpop.f32.mrb[11].mxu1 }
 0x1ac   : > { %v948_v24 = vpop.f32.mrb[10].mxu0  ;;  %v3209_v25 = vadd.f32 %v1118_v15, %v945_v16  ;;  %v694_v26 = vadd.f32 %v693_v23, %v3148_v6  ;;  %1437 = vadd.xlane.f32.xlu0 %v1436_v13  ;;  %v1439_v49 = vadd.f32 %v1373_v30, %v1372_v29 }
 0x1ad   : > { %v950_v28 = vpop.f32.mrb[11].mxu0  ;;  %v949_v31 = vadd.f32 %v948_v24, %v692_v21  ;;  %v1374_v34 = vmul.f32 %v3206_v20, %v3206_v20 }
 0x1ae   : > { %v697_v35 = vpop.f32.mrb[12].mxu1  ;;  %v951_v36 = vadd.f32 %v950_v28, %v694_v26  ;;  %1247 = vadd.xlane.f32.xlu1 %v1246_v19  ;;  %v1249_v38 = vadd.f32 %v3209_v25, %v3206_v20  ;;  %v1375_v39 = vmul.f32 %v3209_v25, %v3209_v25  ;;  %v1125_v26 = vld [vmem:[%s3003_s27 + $0x80] sm:$0xff] }
 0x1af   : > { %v3224_v40 = vadd.f32 %v1119_v27, %v949_v31  ;;  %v698_v41 = vadd.f32 %v697_v35, %v3145_v5  ;;  %v699_v42 = vpop.f32.mrb[13].mxu1  ;;  %v1126_v31 = vld [vmem:[%s3003_s27 + $0x88] sm:$0xff] }
 0x1b0   : > { %v954_v43 = vpop.f32.mrb[12].mxu0  ;;  %v3227_v44 = vadd.f32 %v1120_v32, %v951_v36  ;;  %v700_v45 = vadd.f32 %v699_v42, %v3148_v6  ;;  %1250 = vadd.xlane.f32.xlu0 %v1249_v38  ;;  %v1442_v50 = vadd.f32 %v1375_v39, %v1374_v34 }
 0x1b1   : > { %v956_v47 = vpop.f32.mrb[13].mxu0  ;;  %v955_v51 = vadd.f32 %v954_v43, %v698_v41  ;;  %v1376_v3 = vmul.f32 %v3224_v40, %v3224_v40 }
 0x1b2   : > { %v957_v54 = vadd.f32 %v956_v47, %v700_v45  ;;  %1440 = vadd.xlane.f32.xlu1 %v1439_v49  ;;  %v703_v55 = vpop.f32.mrb[14].mxu1  ;;  %v1252_v56 = vadd.f32 %v3227_v44, %v3224_v40  ;;  %v1377_v7 = vmul.f32 %v3227_v44, %v3227_v44  ;;  %v1127_v45 = vld [vmem:[%s3003_s27 + $0x90] sm:$0xff] }
 0x1b3   : > { %v3234_v57 = vadd.f32 %v1121_v46, %v955_v51  ;;  %v704_v58 = vadd.f32 %v703_v55, %v3145_v5  ;;  %v705_v59 = vpop.f32.mrb[15].mxu1  ;;  %v1128_v51 = vld [vmem:[%s3003_s27 + $0x98] sm:$0xff] }
 0x1b4   : > { %v960_v60 = vpop.f32.mrb[14].mxu0  ;;  %v3237_v61 = vadd.f32 %v1122_v53, %v957_v54  ;;  %v706_v62 = vadd.f32 %v705_v59, %v3148_v6  ;;  %1443 = vadd.xlane.f32.xlu0 %v1442_v50  ;;  %v1445_v28 = vadd.f32 %v1377_v7, %v1376_v3  ;;  %v1129_v7 = vld [vmem:[%s3003_s27 + $0xa0] sm:$0xff] }
 0x1b5   : > { %v962_v0 = vpop.f32.mrb[15].mxu0  ;;  %v961_v8 = vadd.f32 %v960_v60, %v704_v58  ;;  %v1378_v11 = vmul.f32 %v3234_v57, %v3234_v57 }
 0x1b6   : > { %v709_v12 = vpop.f32.mrb[16].mxu1  ;;  %v963_v13 = vadd.f32 %v962_v0, %v706_v62  ;;  %1253 = vadd.xlane.f32.xlu1 %v1252_v56  ;;  %v1255_v14 = vadd.f32 %v3237_v61, %v3234_v57  ;;  %v1379_v15 = vmul.f32 %v3237_v61, %v3237_v61 }
 0x1b7   : > { %v3252_v16 = vadd.f32 %v1123_v63, %v961_v8  ;;  %v710_v17 = vadd.f32 %v709_v12, %v3145_v5  ;;  %v711_v19 = vpop.f32.mrb[17].mxu1 }
 0x1b8   : > { %v966_v21 = vpop.f32.mrb[16].mxu0  ;;  %v3255_v23 = vadd.f32 %v1124_v10, %v963_v13  ;;  %v712_v24 = vadd.f32 %v711_v19, %v3148_v6  ;;  %1256 = vadd.xlane.f32.xlu0 %v1255_v14  ;;  %v1448_v29 = vadd.f32 %v1379_v15, %v1378_v11  ;;  %v1130_v13 = vld [vmem:[%s3003_s27 + $0xa8] sm:$0xff] }
 0x1b9   : > { %v968_v27 = vpop.f32.mrb[17].mxu0  ;;  %v967_v30 = vadd.f32 %v966_v21, %v710_v17  ;;  %v1380_v47 = vmul.f32 %v3252_v16, %v3252_v16 }
 0x1ba   : > { %v969_v32 = vadd.f32 %v968_v27, %v712_v24  ;;  %1446 = vadd.xlane.f32.xlu1 %v1445_v28  ;;  %v715_v34 = vpop.f32.mrb[18].mxu1  ;;  %v1258_v35 = vadd.f32 %v3255_v23, %v3252_v16  ;;  %v1381_v49 = vmul.f32 %v3255_v23, %v3255_v23 }
 0x1bb   : > { %v3262_v36 = vadd.f32 %v1125_v26, %v967_v30  ;;  %v716_v38 = vadd.f32 %v715_v34, %v3145_v5  ;;  %v717_v39 = vpop.f32.mrb[19].mxu1 }
 0x1bc   : > { %v972_v41 = vpop.f32.mrb[18].mxu0  ;;  %v3265_v42 = vadd.f32 %v1126_v31, %v969_v32  ;;  %v718_v43 = vadd.f32 %v717_v39, %v3148_v6  ;;  %1449 = vadd.xlane.f32.xlu0 %v1448_v29  ;;  %v1451_v10 = vadd.f32 %v1381_v49, %v1380_v47  ;;  %v1131_v29 = vld [vmem:[%s3003_s27 + $0xb0] sm:$0xff] }
 0x1bd   : > { %v974_v46 = vpop.f32.mrb[19].mxu0  ;;  %v973_v50 = vadd.f32 %v972_v41, %v716_v38  ;;  %v1382_v53 = vmul.f32 %v3262_v36, %v3262_v36 }
 0x1be   : > { %v721_v54 = vpop.f32.mrb[20].mxu1  ;;  %v975_v55 = vadd.f32 %v974_v46, %v718_v43  ;;  %1259 = vadd.xlane.f32.xlu1 %v1258_v35  ;;  %v1261_v56 = vadd.f32 %v3265_v42, %v3262_v36  ;;  %v1383_v58 = vmul.f32 %v3265_v42, %v3265_v42  ;;  %v1132_v35 = vld [vmem:[%s3003_s27 + $0xb8] sm:$0xff] }
 0x1bf   : > { %v3280_v59 = vadd.f32 %v1127_v45, %v973_v50  ;;  %v722_v60 = vadd.f32 %v721_v54, %v3145_v5  ;;  %v723_v62 = vpop.f32.mrb[21].mxu1  ;;  %v1133_v54 = vld [vmem:[%s3003_s27 + $0xc0] sm:$0xff] }
 0x1c0   : > { %v978_v63 = vpop.f32.mrb[20].mxu0  ;;  %v3283_v0 = vadd.f32 %v1128_v51, %v975_v55  ;;  %v724_v3 = vadd.f32 %v723_v62, %v3148_v6  ;;  %1262 = vadd.xlane.f32.xlu0 %v1261_v56  ;;  %v1454_v11 = vadd.f32 %v1383_v58, %v1382_v53  ;;  %v1134_v62 = vld [vmem:[%s3003_s27 + $0xc8] sm:$0xff] }
 0x1c1   : > { %v980_v8 = vpop.f32.mrb[21].mxu0  ;;  %v979_v12 = vadd.f32 %v978_v63, %v722_v60  ;;  %v1384_v31 = vmul.f32 %v3280_v59, %v3280_v59 }
 0x1c2   : > { %v981_v14 = vadd.f32 %v980_v8, %v724_v3  ;;  %1452 = vadd.xlane.f32.xlu1 %v1451_v10  ;;  %v727_v15 = vpop.f32.mrb[22].mxu1  ;;  %v1264_v17 = vadd.f32 %v3283_v0, %v3280_v59  ;;  %v1385_v32 = vmul.f32 %v3283_v0, %v3283_v0 }
 0x1c3   : > { %v3290_v19 = vadd.f32 %v1129_v7, %v979_v12  ;;  %v728_v21 = vadd.f32 %v727_v15, %v3145_v5  ;;  %v729_v24 = vpop.f32.mrb[23].mxu1  ;;  %v1135_v15 = vld [vmem:[%s3003_s27 + $0xd0] sm:$0xff] }
 0x1c4   : > { %v984_v26 = vpop.f32.mrb[22].mxu0  ;;  %v3293_v27 = vadd.f32 %v1130_v13, %v981_v14  ;;  %v730_v28 = vadd.f32 %v729_v24, %v3148_v6  ;;  %1455 = vadd.xlane.f32.xlu0 %v1454_v11  ;;  %v1457_v56 = vadd.f32 %v1385_v32, %v1384_v31 }
 0x1c5   : > { %v986_v30 = vpop.f32.mrb[23].mxu0  ;;  %v985_v34 = vadd.f32 %v984_v26, %v728_v21  ;;  %v1386_v38 = vmul.f32 %v3290_v19, %v3290_v19 }
 0x1c6   : > { %v733_v39 = vpop.f32.mrb[24].mxu1  ;;  %v987_v41 = vadd.f32 %v986_v30, %v730_v28  ;;  %1265 = vadd.xlane.f32.xlu1 %v1264_v17  ;;  %v1267_v43 = vadd.f32 %v3293_v27, %v3290_v19  ;;  %v1387_v45 = vmul.f32 %v3293_v27, %v3293_v27  ;;  %v1136_v28 = vld [vmem:[%s3003_s27 + $0xd8] sm:$0xff] }
 0x1c7   : > { %v3308_v46 = vadd.f32 %v1131_v29, %v985_v34  ;;  %v734_v47 = vadd.f32 %v733_v39, %v3145_v5  ;;  %v735_v49 = vpop.f32.mrb[25].mxu1 }
 0x1c8   : > { %v990_v50 = vpop.f32.mrb[24].mxu0  ;;  %v3311_v51 = vadd.f32 %v1132_v35, %v987_v41  ;;  %v736_v53 = vadd.f32 %v735_v49, %v3148_v6  ;;  %1268 = vadd.xlane.f32.xlu0 %v1267_v43  ;;  %v1460_v58 = vadd.f32 %v1387_v45, %v1386_v38 }
 0x1c9   : > { %v992_v55 = vpop.f32.mrb[25].mxu0  ;;  %v991_v60 = vadd.f32 %v990_v50, %v734_v47  ;;  %v1388_v21 = vmul.f32 %v3308_v46, %v3308_v46  ;;  %v1137_v47 = vld [vmem:[%s3003_s27 + $0xe0] sm:$0xff] }
 0x1ca   : > { %v993_v63 = vadd.f32 %v992_v55, %v736_v53  ;;  %1458 = vadd.xlane.f32.xlu1 %v1457_v56  ;;  %v739_v3 = vpop.f32.mrb[26].mxu1  ;;  %v1270_v7 = vadd.f32 %v3311_v51, %v3308_v46  ;;  %v1389_v24 = vmul.f32 %v3311_v51, %v3311_v51  ;;  %v1138_v55 = vld [vmem:[%s3003_s27 + $0xe8] sm:$0xff] }
 0x1cb   : > { %v3318_v8 = vadd.f32 %v1133_v54, %v991_v60  ;;  %v740_v10 = vadd.f32 %v739_v3, %v3145_v5  ;;  %v741_v11 = vpop.f32.mrb[27].mxu1 }
 0x1cc   : > { %v996_v12 = vpop.f32.mrb[26].mxu0  ;;  %v3321_v13 = vadd.f32 %v1134_v62, %v993_v63  ;;  %v742_v14 = vadd.f32 %v741_v11, %v3148_v6  ;;  %1461 = vadd.xlane.f32.xlu0 %v1460_v58  ;;  %v1463_v50 = vadd.f32 %v1389_v24, %v1388_v21  ;;  %v1140_v24 = vld [vmem:[%s3003_s27 + $0xf8] sm:$0xff] }
 0x1cd   : > { %v998_v17 = vpop.f32.mrb[27].mxu0  ;;  %v997_v26 = vadd.f32 %v996_v12, %v740_v10  ;;  %v1390_v29 = vmul.f32 %v3318_v8, %v3318_v8  ;;  %v1139_v12 = vld [vmem:[%s3003_s27 + $0xf0] sm:$0xff] }
 0x1ce   : > { %v745_v30 = vpop.f32.mrb[28].mxu1  ;;  %v999_v31 = vadd.f32 %v998_v17, %v742_v14  ;;  %1271 = vadd.xlane.f32.xlu1 %v1270_v7  ;;  %v1273_v32 = vadd.f32 %v3321_v13, %v3318_v8  ;;  %v1391_v34 = vmul.f32 %v3321_v13, %v3321_v13 }
 0x1cf   : > { %v3336_v35 = vadd.f32 %v1135_v15, %v997_v26  ;;  %v746_v38 = vadd.f32 %v745_v30, %v3145_v5  ;;  %v747_v39 = vpop.f32.mrb[29].mxu1 }
 0x1d0   : > { %v1002_v41 = vpop.f32.mrb[28].mxu0  ;;  %v3339_v43 = vadd.f32 %v1136_v28, %v999_v31  ;;  %v748_v45 = vadd.f32 %v747_v39, %v3148_v6  ;;  %1274 = vadd.xlane.f32.xlu0 %v1273_v32  ;;  %v1466_v53 = vadd.f32 %v1391_v34, %v1390_v29 }
 0x1d1   : > { %v1004_v49 = vpop.f32.mrb[29].mxu0  ;;  %v1003_v54 = vadd.f32 %v1002_v41, %v746_v38  ;;  %v1392_v15 = vmul.f32 %v3336_v35, %v3336_v35 }
 0x1d2   : > { %v1005_v56 = vadd.f32 %v1004_v49, %v748_v45  ;;  %1464 = vadd.xlane.f32.xlu1 %v1463_v50  ;;  %v751_v58 = vpop.f32.mrb[30].mxu1  ;;  %v1276_v60 = vadd.f32 %v3339_v43, %v3336_v35  ;;  %v1393_v17 = vmul.f32 %v3339_v43, %v3339_v43 }
 0x1d3   : > { %v3346_v62 = vadd.f32 %v1137_v47, %v1003_v54  ;;  %v752_v63 = vadd.f32 %v751_v58, %v3145_v5  ;;  %v753_v3 = vpop.f32.mrb[31].mxu1  ;;  %v1141_v47 = vld [vmem:[%s3003_s27 + $0x100] sm:$0xff] }
 0x1d4   : > { %v1008_v7 = vpop.f32.mrb[30].mxu0  ;;  %v3349_v10 = vadd.f32 %v1138_v55, %v1005_v56  ;;  %v754_v11 = vadd.f32 %v753_v3, %v3148_v6  ;;  %1467 = vadd.xlane.f32.xlu0 %v1466_v53  ;;  %v1469_v50 = vadd.f32 %v1393_v17, %v1392_v15  ;;  %v1142_v55 = vld [vmem:[%s3003_s27 + $0x108] sm:$0xff]  ;;  %v1143_v15 = vld [vmem:[%s3003_s27 + $0x110] sm:$0xff] }
 0x1d5   : > { %v1010_v14 = vpop.f32.mrb[31].mxu0  ;;  %v1009_v21 = vadd.f32 %v1008_v7, %v752_v63  ;;  %v1394_v26 = vmul.f32 %v3346_v62, %v3346_v62 }
 0x1d6   : > { %v757_v28 = vpop.f32.mrb[32].mxu1  ;;  %v1011_v29 = vadd.f32 %v1010_v14, %v754_v11  ;;  %1277 = vadd.xlane.f32.xlu1 %v1276_v60  ;;  %v1279_v30 = vadd.f32 %v3349_v10, %v3346_v62  ;;  %v1395_v31 = vmul.f32 %v3349_v10, %v3349_v10 }
 0x1d7   : > { %v3364_v32 = vadd.f32 %v1139_v12, %v1009_v21  ;;  %v758_v34 = vadd.f32 %v757_v28, %v3145_v5  ;;  %v759_v38 = vpop.f32.mrb[33].mxu1  ;;  %v1144_v28 = vld [vmem:[%s3003_s27 + $0x118] sm:$0xff] }
 0x1d8   : > { %v1014_v39 = vpop.f32.mrb[32].mxu0  ;;  %v3367_v41 = vadd.f32 %v1140_v24, %v1011_v29  ;;  %v760_v45 = vadd.f32 %v759_v38, %v3148_v6  ;;  %1280 = vadd.xlane.f32.xlu0 %v1279_v30  ;;  %v1472_v53 = vadd.f32 %v1395_v31, %v1394_v26 }
 0x1d9   : > { %v1016_v49 = vpop.f32.mrb[33].mxu0  ;;  %v1015_v54 = vadd.f32 %v1014_v39, %v758_v34  ;;  %v1396_v21 = vmul.f32 %v3364_v32, %v3364_v32 }
 0x1da   : > { %v1017_v56 = vadd.f32 %v1016_v49, %v760_v45  ;;  %1470 = vadd.xlane.f32.xlu1 %v1469_v50  ;;  %v763_v58 = vpop.f32.mrb[34].mxu1  ;;  %v1282_v60 = vadd.f32 %v3367_v41, %v3364_v32  ;;  %v1397_v24 = vmul.f32 %v3367_v41, %v3367_v41 }
 0x1db   : > { %v3374_v63 = vadd.f32 %v1141_v47, %v1015_v54  ;;  %v764_v3 = vadd.f32 %v763_v58, %v3145_v5  ;;  %v765_v7 = vpop.f32.mrb[35].mxu1  ;;  %v1145_v54 = vld [vmem:[%s3003_s27 + $0x120] sm:$0xff] }
 0x1dc   : > { %v1020_v11 = vpop.f32.mrb[34].mxu0  ;;  %v3377_v12 = vadd.f32 %v1142_v55, %v1017_v56  ;;  %v766_v14 = vadd.f32 %v765_v7, %v3148_v6  ;;  %1473 = vadd.xlane.f32.xlu0 %v1472_v53  ;;  %v1475_v56 = vadd.f32 %v1397_v24, %v1396_v21  ;;  %v1147_v24 = vld [vmem:[%s3003_s27 + $0x130] sm:$0xff] }
 0x1dd   : > { %v1022_v17 = vpop.f32.mrb[35].mxu0  ;;  %v1021_v26 = vadd.f32 %v1020_v11, %v764_v3  ;;  %v1398_v29 = vmul.f32 %v3374_v63, %v3374_v63  ;;  %v1146_v3 = vld [vmem:[%s3003_s27 + $0x128] sm:$0xff] }
 0x1de   : > { %v769_v30 = vpop.f32.mrb[36].mxu1  ;;  %v1023_v31 = vadd.f32 %v1022_v17, %v766_v14  ;;  %1283 = vadd.xlane.f32.xlu1 %v1282_v60  ;;  %v1285_v34 = vadd.f32 %v3377_v12, %v3374_v63  ;;  %v1399_v38 = vmul.f32 %v3377_v12, %v3377_v12 }
 0x1df   : > { %v3392_v39 = vadd.f32 %v1143_v15, %v1021_v26  ;;  %v770_v45 = vadd.f32 %v769_v30, %v3145_v5  ;;  %v771_v47 = vpop.f32.mrb[37].mxu1 }
 0x1e0   : > { %v1026_v49 = vpop.f32.mrb[36].mxu0  ;;  %v3395_v50 = vadd.f32 %v1144_v28, %v1023_v31  ;;  %v772_v53 = vadd.f32 %v771_v47, %v3148_v6  ;;  %1286 = vadd.xlane.f32.xlu0 %v1285_v34  ;;  %v1478_v58 = vadd.f32 %v1399_v38, %v1398_v29 }
 0x1e1   : > { %v1028_v55 = vpop.f32.mrb[37].mxu0  ;;  %v1027_v60 = vadd.f32 %v1026_v49, %v770_v45  ;;  %v1400_v31 = vmul.f32 %v3392_v39, %v3392_v39  ;;  %v1148_v45 = vld [vmem:[%s3003_s27 + $0x138] sm:$0xff] }
 0x1e2   : > { %v1029_v7 = vadd.f32 %v1028_v55, %v772_v53  ;;  %1476 = vadd.xlane.f32.xlu1 %v1475_v56  ;;  %v775_v11 = vpop.f32.mrb[38].mxu1  ;;  %v1288_v14 = vadd.f32 %v3395_v50, %v3392_v39  ;;  %v1401_v34 = vmul.f32 %v3395_v50, %v3395_v50 }
 0x1e3   : > { %v3402_v15 = vadd.f32 %v1145_v54, %v1027_v60  ;;  %v776_v17 = vadd.f32 %v775_v11, %v3145_v5  ;;  %v777_v26 = vpop.f32.mrb[39].mxu1 }
 0x1e4   : > { %v1032_v28 = vpop.f32.mrb[38].mxu0  ;;  %v3405_v30 = vadd.f32 %v1146_v3, %v1029_v7  ;;  %v778_v21 = vadd.f32 %v777_v26, %v3148_v6  ;;  %1479 = vadd.xlane.f32.xlu0 %v1478_v58 }
 0x1e5   : > { %4166 = vst [vmem:[#allocation14_spill] sm:$0xff] %v3402_v15  ;;  %v1034_v29 = vpop.f32.mrb[39].mxu0  ;;  %v1033_v38 = vadd.f32 %v1032_v28, %v776_v17  ;;  %v1402_v47 = vmul.f32 %v3402_v15, %v3402_v15  ;;  %v1149_v17 = vld [vmem:[%s3003_s27 + $0x140] sm:$0xff] }
 0x1e6   : > { %4167 = vst [vmem:[#allocation15_spill] sm:$0xff] %v3405_v30  ;;  %v781_v49 = vpop.f32.mrb[40].mxu1  ;;  %v1035_v53 = vadd.f32 %v1034_v29, %v778_v21  ;;  %1289 = vadd.xlane.f32.xlu1 %v1288_v14  ;;  %v1291_v54 = vadd.f32 %v3405_v30, %v3402_v15  ;;  %v1403_v55 = vmul.f32 %v3405_v30, %v3405_v30  ;;  %v1150_v29 = vld [vmem:[%s3003_s27 + $0x148] sm:$0xff] }
 0x1e7   : > { %v3420_v56 = vadd.f32 %v1147_v24, %v1033_v38  ;;  %v782_v58 = vadd.f32 %v781_v49, %v3145_v5  ;;  %v783_v60 = vpop.f32.mrb[41].mxu1  ;;  %v1481_v14 = vadd.f32 %v1401_v34, %v1400_v31  ;;  %v1151_v34 = vld [vmem:[%s3003_s27 + $0x150] sm:$0xff] }
 0x1e8   : > { %v1038_v3 = vpop.f32.mrb[40].mxu0  ;;  %v3423_v7 = vadd.f32 %v1148_v45, %v1035_v53  ;;  %v784_v11 = vadd.f32 %v783_v60, %v3148_v6  ;;  %1292 = vadd.xlane.f32.xlu0 %v1291_v54  ;;  %v1484_v28 = vadd.f32 %v1403_v55, %v1402_v47 }
 0x1e9   : > { %4168 = vst [vmem:[#allocation16_spill] sm:$0xff] %v3420_v56  ;;  %v1040_v26 = vpop.f32.mrb[41].mxu0  ;;  %v1039_v21 = vadd.f32 %v1038_v3, %v782_v58  ;;  %v1404_v55 = vmul.f32 %v3420_v56, %v3420_v56 }
 0x1ea   : > { %4169 = vst [vmem:[#allocation17_spill] sm:$0xff] %v3423_v7  ;;  %v1041_v15 = vadd.f32 %v1040_v26, %v784_v11  ;;  %1482 = vadd.xlane.f32.xlu1 %v1481_v14  ;;  %v787_v24 = vpop.f32.mrb[42].mxu1  ;;  %v1294_v38 = vadd.f32 %v3423_v7, %v3420_v56  ;;  %v1405_v58 = vmul.f32 %v3423_v7, %v3423_v7  ;;  %v1152_v11 = vld [vmem:[%s3003_s27 + $0x158] sm:$0xff]  ;;  %v1153_v7 = vld [vmem:[%s3003_s27 + $0x160] sm:$0xff]  ;;  %v1154_v56 = vld [vmem:[%s3003_s27 + $0x168] sm:$0xff] }
 0x1eb   : > { %v3430_v49 = vadd.f32 %v1149_v17, %v1039_v21  ;;  %v788_v45 = vadd.f32 %v787_v24, %v3145_v5  ;;  %v789_v53 = vpop.f32.mrb[43].mxu1 }
 0x1ec   : > { %v1044_v60 = vpop.f32.mrb[42].mxu0  ;;  %v3433_v54 = vadd.f32 %v1150_v29, %v1041_v15  ;;  %v790_v31 = vadd.f32 %v789_v53, %v3148_v6  ;;  %1485 = vadd.xlane.f32.xlu0 %v1484_v28 }
 0x1ed   : > { %4170 = vst [vmem:[#allocation18_spill] sm:$0xff] %v3430_v49  ;;  %v1046_v47 = vpop.f32.mrb[43].mxu0  ;;  %v1045_v3 = vadd.f32 %v1044_v60, %v788_v45  ;;  %v1406_v17 = vmul.f32 %v3430_v49, %v3430_v49 }
 0x1ee   : > { %4171 = vst [vmem:[#allocation19_spill] sm:$0xff] %v3433_v54  ;;  %v793_v26 = vpop.f32.mrb[44].mxu1  ;;  %v1047_v15 = vadd.f32 %v1046_v47, %v790_v31  ;;  %1295 = vadd.xlane.f32.xlu1 %v1294_v38  ;;  %v1297_v14 = vadd.f32 %v3433_v54, %v3430_v49  ;;  %v1407_v28 = vmul.f32 %v3433_v54, %v3433_v54 }
 0x1ef   : > { %v3448_v21 = vadd.f32 %v1151_v34, %v1045_v3  ;;  %v794_v29 = vadd.f32 %v793_v26, %v3145_v5  ;;  %v795_v24 = vpop.f32.mrb[45].mxu1  ;;  %v1487_v38 = vadd.f32 %v1405_v58, %v1404_v55  ;;  %v1155_v58 = vld [vmem:[%s3003_s27 + $0x170] sm:$0xff] }
 0x1f0   : > { %v1050_v45 = vpop.f32.mrb[44].mxu0  ;;  %v3451_v53 = vadd.f32 %v1152_v11, %v1047_v15  ;;  %v796_v60 = vadd.f32 %v795_v24, %v3148_v6  ;;  %1298 = vadd.xlane.f32.xlu0 %v1297_v14  ;;  %v1490_v47 = vadd.f32 %v1407_v28, %v1406_v17 }
 0x1f1   : > { %4172 = vst [vmem:[#allocation20_spill] sm:$0xff] %v3448_v21  ;;  %v1052_v31 = vpop.f32.mrb[45].mxu0  ;;  %v1051_v49 = vadd.f32 %v1050_v45, %v794_v29  ;;  %v1408_v28 = vmul.f32 %v3448_v21, %v3448_v21 }
 0x1f2   : > { %4173 = vst [vmem:[#allocation21_spill] sm:$0xff] %v3451_v53  ;;  %v1053_v30 = vadd.f32 %v1052_v31, %v796_v60  ;;  %1488 = vadd.xlane.f32.xlu1 %v1487_v38  ;;  %v799_v34 = vpop.f32.mrb[46].mxu1  ;;  %v1300_v3 = vadd.f32 %v3451_v53, %v3448_v21  ;;  %v1409_v29 = vmul.f32 %v3451_v53, %v3451_v53  ;;  %v1157_v53 = vld [vmem:[%s3003_s27 + $0x180] sm:$0xff]  ;;  %v1158_v21 = vld [vmem:[%s3003_s27 + $0x188] sm:$0xff] }
 0x1f3   : > { %v3458_v26 = vadd.f32 %v1153_v7, %v1051_v49  ;;  %v800_v11 = vadd.f32 %v799_v34, %v3145_v5  ;;  %v801_v15 = vpop.f32.mrb[47].mxu1  ;;  %v1156_v49 = vld [vmem:[%s3003_s27 + $0x178] sm:$0xff] }
 0x1f4   : > { %v1056_v24 = vpop.f32.mrb[46].mxu0  ;;  %v3461_v14 = vadd.f32 %v1154_v56, %v1053_v30  ;;  %v802_v55 = vadd.f32 %v801_v15, %v3148_v6  ;;  %1491 = vadd.xlane.f32.xlu0 %v1490_v47 }
 0x1f5   : > { %4174 = vst [vmem:[#allocation22_spill] sm:$0xff] %v3458_v26  ;;  %v1058_v17 = vpop.f32.mrb[47].mxu0  ;;  %v1057_v7 = vadd.f32 %v1056_v24, %v800_v11  ;;  %v1410_v45 = vmul.f32 %v3458_v26, %v3458_v26 }
 0x1f6   : > { %4175 = vst [vmem:[#allocation23_spill] sm:$0xff] %v3461_v14  ;;  %v805_v60 = vpop.f32.mrb[48].mxu1  ;;  %v1059_v30 = vadd.f32 %v1058_v17, %v802_v55  ;;  %1301 = vadd.xlane.f32.xlu1 %v1300_v3  ;;  %v1303_v56 = vadd.f32 %v3461_v14, %v3458_v26  ;;  %v1411_v31 = vmul.f32 %v3461_v14, %v3461_v14 }
 0x1f7   : > { %v3476_v38 = vadd.f32 %v1155_v58, %v1057_v7  ;;  %v806_v47 = vadd.f32 %v805_v60, %v3145_v5  ;;  %v807_v34 = vpop.f32.mrb[49].mxu1  ;;  %v1493_v3 = vadd.f32 %v1409_v29, %v1408_v28  ;;  %v1159_v29 = vld [vmem:[%s3003_s27 + $0x190] sm:$0xff] }
 0x1f8   : > { %v1062_v11 = vpop.f32.mrb[48].mxu0  ;;  %v3479_v15 = vadd.f32 %v1156_v49, %v1059_v30  ;;  %v808_v24 = vadd.f32 %v807_v34, %v3148_v6  ;;  %1304 = vadd.xlane.f32.xlu0 %v1303_v56  ;;  %v1496_v17 = vadd.f32 %v1411_v31, %v1410_v45 }
 0x1f9   : > { %4176 = vst [vmem:[#allocation24_spill] sm:$0xff] %v3476_v38  ;;  %v1064_v55 = vpop.f32.mrb[49].mxu0  ;;  %v1063_v26 = vadd.f32 %v1062_v11, %v806_v47  ;;  %v1412_v31 = vmul.f32 %v3476_v38, %v3476_v38 }
 0x1fa   : > { %4177 = vst [vmem:[#allocation25_spill] sm:$0xff] %v3479_v15  ;;  %v1065_v54 = vadd.f32 %v1064_v55, %v808_v24  ;;  %1494 = vadd.xlane.f32.xlu1 %v1493_v3  ;;  %v811_v58 = vpop.f32.mrb[50].mxu1  ;;  %v1306_v7 = vadd.f32 %v3479_v15, %v3476_v38  ;;  %v1413_v47 = vmul.f32 %v3479_v15, %v3479_v15  ;;  %v1161_v15 = vld [vmem:[%s3003_s27 + $0x1a0] sm:$0xff]  ;;  %v1162_v38 = vld [vmem:[%s3003_s27 + $0x1a8] sm:$0xff] }
 0x1fb   : > { %v3486_v60 = vadd.f32 %v1157_v53, %v1063_v26  ;;  %v812_v49 = vadd.f32 %v811_v58, %v3145_v5  ;;  %v813_v30 = vpop.f32.mrb[51].mxu1  ;;  %v1160_v26 = vld [vmem:[%s3003_s27 + $0x198] sm:$0xff] }
 0x1fc   : > { %v1068_v34 = vpop.f32.mrb[50].mxu0  ;;  %v3489_v56 = vadd.f32 %v1158_v21, %v1065_v54  ;;  %v814_v28 = vadd.f32 %v813_v30, %v3148_v6  ;;  %1497 = vadd.xlane.f32.xlu0 %v1496_v17 }
 0x1fd   : > { %4178 = vst [vmem:[#allocation26_spill] sm:$0xff] %v3486_v60  ;;  %v1070_v45 = vpop.f32.mrb[51].mxu0  ;;  %v1069_v53 = vadd.f32 %v1068_v34, %v812_v49  ;;  %v1414_v11 = vmul.f32 %v3486_v60, %v3486_v60 }
 0x1fe   : > { %4179 = vst [vmem:[#allocation27_spill] sm:$0xff] %v3489_v56  ;;  %v817_v24 = vpop.f32.mrb[52].mxu1  ;;  %v1071_v54 = vadd.f32 %v1070_v45, %v814_v28  ;;  %1307 = vadd.xlane.f32.xlu1 %v1306_v7  ;;  %v1309_v21 = vadd.f32 %v3489_v56, %v3486_v60  ;;  %v1415_v55 = vmul.f32 %v3489_v56, %v3489_v56 }
 0x1ff   : > { %v3504_v3 = vadd.f32 %v1159_v29, %v1069_v53  ;;  %v818_v17 = vadd.f32 %v817_v24, %v3145_v5  ;;  %v819_v58 = vpop.f32.mrb[53].mxu1  ;;  %v1499_v7 = vadd.f32 %v1413_v47, %v1412_v31  ;;  %v1163_v47 = vld [vmem:[%s3003_s27 + $0x1b0] sm:$0xff] }
 0x200   : > { %v1074_v49 = vpop.f32.mrb[52].mxu0  ;;  %v3507_v30 = vadd.f32 %v1160_v26, %v1071_v54  ;;  %v820_v34 = vadd.f32 %v819_v58, %v3148_v6  ;;  %1310 = vadd.xlane.f32.xlu0 %v1309_v21  ;;  %v1502_v45 = vadd.f32 %v1415_v55, %v1414_v11 }
 0x201   : > { %4180 = vst [vmem:[#allocation28_spill] sm:$0xff] %v3504_v3  ;;  %v1076_v28 = vpop.f32.mrb[53].mxu0  ;;  %v1075_v60 = vadd.f32 %v1074_v49, %v818_v17  ;;  %v1416_v55 = vmul.f32 %v3504_v3, %v3504_v3 }
 0x202   : > { %4181 = vst [vmem:[#allocation29_spill] sm:$0xff] %v3507_v30  ;;  %v1077_v14 = vadd.f32 %v1076_v28, %v820_v34  ;;  %1500 = vadd.xlane.f32.xlu1 %v1499_v7  ;;  %v823_v29 = vpop.f32.mrb[54].mxu1  ;;  %v1312_v53 = vadd.f32 %v3507_v30, %v3504_v3  ;;  %v1417_v17 = vmul.f32 %v3507_v30, %v3507_v30  ;;  %v1165_v30 = vld [vmem:[%s3003_s27 + $0x1c0] sm:$0xff]  ;;  %v1166_v3 = vld [vmem:[%s3003_s27 + $0x1c8] sm:$0xff] }
 0x203   : > { %v3514_v24 = vadd.f32 %v1161_v15, %v1075_v60  ;;  %v824_v26 = vadd.f32 %v823_v29, %v3145_v5  ;;  %v825_v54 = vpop.f32.mrb[55].mxu1  ;;  %v1164_v60 = vld [vmem:[%s3003_s27 + $0x1b8] sm:$0xff] }
 0x204   : > { %v1080_v58 = vpop.f32.mrb[54].mxu0  ;;  %v3517_v21 = vadd.f32 %v1162_v38, %v1077_v14  ;;  %v826_v31 = vadd.f32 %v825_v54, %v3148_v6  ;;  %1503 = vadd.xlane.f32.xlu0 %v1502_v45 }
 0x205   : > { %4182 = vst [vmem:[#allocation30_spill] sm:$0xff] %v3514_v24  ;;  %v1082_v11 = vpop.f32.mrb[55].mxu0  ;;  %v1081_v15 = vadd.f32 %v1080_v58, %v824_v26  ;;  %v1418_v49 = vmul.f32 %v3514_v24, %v3514_v24 }
 0x206   : > { %4183 = vst [vmem:[#allocation31_spill] sm:$0xff] %v3517_v21  ;;  %v829_v34 = vpop.f32.mrb[56].mxu1  ;;  %v1083_v14 = vadd.f32 %v1082_v11, %v826_v31  ;;  %1313 = vadd.xlane.f32.xlu1 %v1312_v53  ;;  %v1315_v38 = vadd.f32 %v3517_v21, %v3514_v24  ;;  %v1419_v28 = vmul.f32 %v3517_v21, %v3517_v21 }
 0x207   : > { %v3532_v7 = vadd.f32 %v1163_v47, %v1081_v15  ;;  %v830_v45 = vadd.f32 %v829_v34, %v3145_v5  ;;  %v831_v29 = vpop.f32.mrb[57].mxu1  ;;  %v1505_v53 = vadd.f32 %v1417_v17, %v1416_v55  ;;  %v1167_v17 = vld [vmem:[%s3003_s27 + $0x1d0] sm:$0xff] }
 0x208   : > { %v1086_v26 = vpop.f32.mrb[56].mxu0  ;;  %v3535_v54 = vadd.f32 %v1164_v60, %v1083_v14  ;;  %v832_v58 = vadd.f32 %v831_v29, %v3148_v6  ;;  %1316 = vadd.xlane.f32.xlu0 %v1315_v38  ;;  %v1508_v11 = vadd.f32 %v1419_v28, %v1418_v49 }
 0x209   : > { %4184 = vst [vmem:[#allocation32_spill] sm:$0xff] %v3532_v7  ;;  %v1088_v31 = vpop.f32.mrb[57].mxu0  ;;  %v1087_v24 = vadd.f32 %v1086_v26, %v830_v45  ;;  %v1420_v28 = vmul.f32 %v3532_v7, %v3532_v7 }
 0x20a   : > { %4185 = vst [vmem:[#allocation33_spill] sm:$0xff] %v3535_v54  ;;  %v1089_v56 = vadd.f32 %v1088_v31, %v832_v58  ;;  %1506 = vadd.xlane.f32.xlu1 %v1505_v53  ;;  %v835_v47 = vpop.f32.mrb[58].mxu1  ;;  %v1318_v15 = vadd.f32 %v3535_v54, %v3532_v7  ;;  %v1421_v45 = vmul.f32 %v3535_v54, %v3535_v54  ;;  %v1169_v54 = vld [vmem:[%s3003_s27 + $0x1e0] sm:$0xff]  ;;  %v1170_v7 = vld [vmem:[%s3003_s27 + $0x1e8] sm:$0xff] }
 0x20b   : > { %v3542_v34 = vadd.f32 %v1165_v30, %v1087_v24  ;;  %v836_v60 = vadd.f32 %v835_v47, %v3145_v5  ;;  %v837_v14 = vpop.f32.mrb[59].mxu1  ;;  %v1168_v24 = vld [vmem:[%s3003_s27 + $0x1d8] sm:$0xff] }
 0x20c   : > { %v1092_v29 = vpop.f32.mrb[58].mxu0  ;;  %v3545_v38 = vadd.f32 %v1166_v3, %v1089_v56  ;;  %v838_v55 = vadd.f32 %v837_v14, %v3148_v6  ;;  %1509 = vadd.xlane.f32.xlu0 %v1508_v11 }
 0x20d   : > { %4186 = vst [vmem:[#allocation34_spill] sm:$0xff] %v3542_v34  ;;  %v1094_v49 = vpop.f32.mrb[59].mxu0  ;;  %v1093_v30 = vadd.f32 %v1092_v29, %v836_v60  ;;  %v1422_v26 = vmul.f32 %v3542_v34, %v3542_v34 }
 0x20e   : > { %v841_v58 = vpop.f32.mrb[60].mxu1  ;;  %v1095_v56 = vadd.f32 %v1094_v49, %v838_v55  ;;  %1319 = vadd.xlane.f32.xlu1 %v1318_v15  ;;  %v1321_v3 = vadd.f32 %v3545_v38, %v3542_v34  ;;  %v1423_v31 = vmul.f32 %v3545_v38, %v3545_v38  ;;  %v1511_v15 = vadd.f32 %v1421_v45, %v1420_v28  ;;  %v1171_v45 = vld [vmem:[%s3003_s27 + $0x1f0] sm:$0xff] }
 0x20f   : > { %v3560_v53 = vadd.f32 %v1167_v17, %v1093_v30  ;;  %v842_v11 = vadd.f32 %v841_v58, %v3145_v5  ;;  %v843_v47 = vpop.f32.mrb[61].mxu1 }
 0x210   : > { %v1098_v60 = vpop.f32.mrb[60].mxu0  ;;  %v3563_v14 = vadd.f32 %v1168_v24, %v1095_v56  ;;  %v844_v29 = vadd.f32 %v843_v47, %v3148_v6  ;;  %1322 = vadd.xlane.f32.xlu0 %v1321_v3  ;;  %v1514_v49 = vadd.f32 %v1423_v31, %v1422_v26 }
 0x211   : > { %4187 = vst [vmem:[#allocation35_spill] sm:$0xff] %v3560_v53  ;;  %v1100_v55 = vpop.f32.mrb[61].mxu0  ;;  %v1099_v34 = vadd.f32 %v1098_v60, %v842_v11  ;;  %v1424_v31 = vmul.f32 %v3560_v53, %v3560_v53 }
 0x212   : > { %4188 = vst [vmem:[#allocation36_spill] sm:$0xff] %v3563_v14  ;;  %v1101_v21 = vadd.f32 %v1100_v55, %v844_v29  ;;  %1512 = vadd.xlane.f32.xlu1 %v1511_v15  ;;  %v847_v17 = vpop.f32.mrb[62].mxu1  ;;  %v1324_v30 = vadd.f32 %v3563_v14, %v3560_v53  ;;  %v1425_v11 = vmul.f32 %v3563_v14, %v3563_v14 }
 0x213   : > { %v3570_v58 = vadd.f32 %v1169_v54, %v1099_v34  ;;  %v848_v24 = vadd.f32 %v847_v17, %v3145_v5  ;;  %v849_v56 = vpop.f32.mrb[63].mxu1  ;;  %v1172_v54 = vld [vmem:[%s3003_s27 + $0x1f8] sm:$0xff] }
 0x214   : > { %v1104_v47 = vpop.f32.mrb[62].mxu0  ;;  %v3573_v3 = vadd.f32 %v1170_v7, %v1101_v21  ;;  %v850_v28 = vadd.f32 %v849_v56, %v3148_v6  ;;  %1515 = vadd.xlane.f32.xlu0 %v1514_v49  ;;  %v1517_v55 = vadd.f32 %v1425_v11, %v1424_v31 }
 0x215   : > { %4189 = vst [vmem:[#allocation37_spill] sm:$0xff] %v3570_v58  ;;  %v1106_v26 = vpop.f32.mrb[63].mxu0  ;;  %v1105_v60 = vadd.f32 %v1104_v47, %v848_v24  ;;  %v1426_v5 = vmul.f32 %v3570_v58, %v3570_v58 }
 0x216   : > { %4190 = vst [vmem:[#allocation38_spill] sm:$0xff] %v3573_v3  ;;  %v1107_v34 = vadd.f32 %v1106_v26, %v850_v28  ;;  %1325 = vadd.xlane.f32.xlu1 %v1324_v30  ;;  %v1327_v21 = vadd.f32 %v3573_v3, %v3570_v58  ;;  %v1427_v6 = vmul.f32 %v3573_v3, %v3573_v3 }
 0x217   : > { %v3588_v7 = vadd.f32 %v1171_v45, %v1105_v60 }
 0x218   : > { %v3590_v29 = vadd.f32 %v1172_v54, %v1107_v34  ;;  %1328 = vadd.xlane.f32.xlu0 %v1327_v21  ;;  %v1520_v15 = vadd.f32 %v1427_v6, %v1426_v5 }
 0x219   : > { %4191 = vst [vmem:[#allocation39_spill] sm:$0xff] %v3588_v7  ;;  %v1428_v17 = vmul.f32 %v3588_v7, %v3588_v7 }
 0x21a   : > { %4192 = vst [vmem:[#allocation40_spill] sm:$0xff] %v3590_v29  ;;  %1518 = vadd.xlane.f32.xlu1 %v1517_v55  ;;  %v1330_v49 = vadd.f32 %v3590_v29, %v3588_v7  ;;  %v1429_v30 = vmul.f32 %v3590_v29, %v3590_v29 }
 0x21c   : > { %1521 = vadd.xlane.f32.xlu0 %v1520_v15  ;;  %v1523_v24 = vadd.f32 %v1429_v30, %v1428_v17 }
 0x21e   : > { %1331 = vadd.xlane.f32.xlu1 %v1330_v49 }
 0x222   : > { %1524 = vadd.xlane.f32.xlu1 %v1523_v24 }
 0x22d   : > { %v1239_v56 = vpop.xlane.xlu0 %1238 }
 0x22e   : > { %v1334_v47 = vmul.f32 0.00390625, %v1239_v56 }
 0x230   : > { %v1558_v45 = vmul.f32 %v1334_v47, %v1334_v47 }
 0x231   : > { %v1432_v28 = vpop.xlane.xlu0 %1431 }
 0x232   : > { %v1526_v26 = vmul.f32 0.00390625, %v1432_v28 }
 0x233   : > { %v1435_v31 = vpop.xlane.xlu1 %1434 }
 0x234   : > { %v1590_v11 = vsub.f32 %v1526_v26, %v1558_v45  ;;  %v1527_v6 = vmul.f32 0.00390625, %v1435_v31 }
 0x235   : > { %v1242_v60 = vpop.xlane.xlu0 %1241 }
 0x236   : > { %v1622_v54 = vmax.f32 %v1590_v11, 0.0  ;;  %v3598_v5 = vmul.f32 0.00390625, %v1242_v60 }
 0x237   : > { %v1245_v34 = vpop.xlane.xlu1 %1244 }
 0x238   : > { %v1654_v21 = vadd.f32 1e-12, %v1622_v54  ;;  %v1559_v55 = vmul.f32 %v3598_v5, %v3598_v5  ;;  %v3602_v15 = vmul.f32 0.00390625, %v1245_v34  ;;  %v1846_v54 = vld [vmem:[%s4117_s4] sm:$0x3] }
 0x239   : > { %v1438_v49 = vpop.xlane.xlu0 %1437 }
 0x23a   : > { %2533 = vrsqrt.f32 %v1654_v21  ;;  %v1591_v17 = vsub.f32 %v1527_v6, %v1559_v55  ;;  %v1528_v30 = vmul.f32 0.00390625, %v1438_v49  ;;  %v1560_v24 = vmul.f32 %v3602_v15, %v3602_v15 }
 0x23b   : > { %v1248_v56 = vpop.xlane.xlu1 %1247 }
 0x23c   : > { %v1623_v28 = vmax.f32 %v1591_v17, 0.0  ;;  %v3606_v45 = vmul.f32 0.00390625, %v1248_v56  ;;  %v1592_v26 = vsub.f32 %v1528_v30, %v1560_v24  ;;  %v3618_v24 = vrot.slane %v1846_v54, %v3137_v2  ;;  %v1922_v56 = vld [vmem:[%s4118_s5] sm:$0x3] }
 0x23d   : > { %v1251_v11 = vpop.xlane.xlu0 %1250  ;;  %v3631_v14 = vrot.slane %v1922_v56, %v3137_v2 }
 0x23e   : > { %v1655_v60 = vadd.f32 1e-12, %v1623_v28  ;;  %v3608_v31 = vmul.f32 0.00390625, %v1251_v11  ;;  %v1624_v34 = vmax.f32 %v1592_v26, 0.0  ;;  %v1561_v6 = vmul.f32 %v3606_v45, %v3606_v45 }
 0x23f   : > { %v1441_v21 = vpop.xlane.xlu1 %1440  ;;  %v1718_v11 = vsub.f32 %v3154_v18, %v1334_v47 }
 0x240   : > { %2535 = vrsqrt.f32 %v1655_v60  ;;  %v1529_v55 = vmul.f32 0.00390625, %v1441_v21  ;;  %v1656_v49 = vadd.f32 1e-12, %v1624_v34  ;;  %v1562_v17 = vmul.f32 %v3608_v31, %v3608_v31 }
 0x241   : > { %v1444_v30 = vpop.xlane.xlu0 %1443  ;;  %v1719_v60 = vsub.f32 %v3157_v22, %v1334_v47  ;;  %v3626_v21 = vrot.slane %v1846_v54, %v3142_v4 }
 0x242   : > { %v1593_v28 = vsub.f32 %v1529_v55, %v1561_v6  ;;  %v1530_v26 = vmul.f32 0.00390625, %v1444_v30  ;;  %2537 = vrsqrt.f32 %v1656_v49  ;;  %v3634_v6 = vrot.slane %v1922_v56, %v3142_v4 }
 0x243   : > { %v1254_v34 = vpop.xlane.xlu1 %1253 }
 0x244   : > { %v2534_v29 = vpop.eup %2533  ;;  %v1625_v7 = vmax.f32 %v1593_v28, 0.0  ;;  %v1594_v3 = vsub.f32 %v1530_v26, %v1562_v17  ;;  %v3628_v58 = vmul.f32 0.00390625, %v1254_v34 }
 0x245   : > { %v1782_v55 = vmul.f32 %v2534_v29, %v1718_v11  ;;  %v1783_v18 = vmul.f32 %v2534_v29, %v1719_v60  ;;  %v1257_v30 = vpop.xlane.xlu0 %1256 }
 0x246   : > { %v1657_v22 = vadd.f32 1e-12, %v1625_v7  ;;  %v1626_v47 = vmax.f32 %v1594_v3, 0.0  ;;  %v3638_v53 = vmul.f32 0.00390625, %v1257_v30  ;;  %v1563_v2 = vmul.f32 %v3628_v58, %v3628_v58 }
 0x247   : > { %v1858_v54 = vmul.f32 %v3618_v24, %v1782_v55  ;;  %v1859_v49 = vmul.f32 %v3626_v21, %v1783_v18  ;;  %v1447_v17 = vpop.xlane.xlu1 %1446  ;;  %v1720_v3 = vsub.f32 %v3168_v33, %v3598_v5  ;;  %v1721_v7 = vsub.f32 %v3171_v37, %v3598_v5 }
 0x248   : > { %2539 = vrsqrt.f32 %v1657_v22  ;;  %v1658_v28 = vadd.f32 1e-12, %v1626_v47  ;;  %v1531_v4 = vmul.f32 0.00390625, %v1447_v17  ;;  %v1564_v34 = vmul.f32 %v3638_v53, %v3638_v53 }
 0x249   : > { %v1934_v56 = vadd.f32 %v3631_v14, %v1858_v54  ;;  %v1935_v29 = vadd.f32 %v3634_v6, %v1859_v49  ;;  %v1450_v26 = vpop.xlane.xlu0 %1449  ;;  %v1722_v37 = vsub.f32 %v3180_v48, %v3602_v15  ;;  %v1723_v5 = vsub.f32 %v3183_v52, %v3602_v15 }
 0x24a   : > { %v2536_v11 = vpop.eup %2535  ;;  %2541 = vrsqrt.f32 %v1658_v28  ;;  %v1595_v60 = vsub.f32 %v1531_v4, %v1563_v2  ;;  %v1532_v55 = vmul.f32 0.00390625, %v1450_v26  ;;  %v1724_v15 = vsub.f32 %v3196_v1, %v3606_v45 }
 0x24b   : > { %1998 = vst [vmem:[%s3652_s29] sm:$0xff] %v1934_v56  ;;  %1999 = vst [vmem:[%s3652_s29 + $0x8] sm:$0xff] %v1935_v29  ;;  %v1784_v18 = vmul.f32 %v2536_v11, %v1720_v3  ;;  %v1785_v33 = vmul.f32 %v2536_v11, %v1721_v7  ;;  %v1260_v30 = vpop.xlane.xlu1 %1259 }
 0x24c   : > { %v1627_v22 = vmax.f32 %v1595_v60, 0.0  ;;  %v1596_v47 = vsub.f32 %v1532_v55, %v1564_v34  ;;  %v2538_v54 = vpop.eup %2537  ;;  %v3662_v28 = vmul.f32 0.00390625, %v1260_v30  ;;  %v1725_v34 = vsub.f32 %v3199_v9, %v3606_v45 }
 0x24d   : > { %v1860_v49 = vmul.f32 %v3618_v24, %v1784_v18  ;;  %v1861_v17 = vmul.f32 %v3626_v21, %v1785_v33  ;;  %v1263_v2 = vpop.xlane.xlu0 %1262  ;;  %v1786_v4 = vmul.f32 %v2538_v54, %v1722_v37  ;;  %v1787_v56 = vmul.f32 %v2538_v54, %v1723_v5 }
 0x24e   : > { %v1659_v29 = vadd.f32 1e-12, %v1627_v22  ;;  %v1628_v3 = vmax.f32 %v1596_v47, 0.0  ;;  %v3674_v55 = vmul.f32 0.00390625, %v1263_v2  ;;  %v1565_v18 = vmul.f32 %v3662_v28, %v3662_v28 }
 0x24f   : > { %v1936_v48 = vadd.f32 %v3631_v14, %v1860_v49  ;;  %v1937_v52 = vadd.f32 %v3634_v6, %v1861_v17  ;;  %v1453_v7 = vpop.xlane.xlu1 %1452  ;;  %v1862_v26 = vmul.f32 %v3618_v24, %v1786_v4  ;;  %v1863_v11 = vmul.f32 %v3626_v21, %v1787_v56 }
 0x250   : > { %2543 = vrsqrt.f32 %v1659_v29  ;;  %v1660_v60 = vadd.f32 1e-12, %v1628_v3  ;;  %v1533_v1 = vmul.f32 0.00390625, %v1453_v7  ;;  %v1726_v47 = vsub.f32 %v3206_v20, %v3608_v31 }
 0x251   : > { %2000 = vst [vmem:[%s3652_s29 + $0x10] sm:$0xff] %v1936_v48  ;;  %2001 = vst [vmem:[%s3652_s29 + $0x18] sm:$0xff] %v1937_v52  ;;  %v1456_v33 = vpop.xlane.xlu0 %1455  ;;  %v1938_v37 = vadd.f32 %v3631_v14, %v1862_v26  ;;  %v1939_v5 = vadd.f32 %v3634_v6, %v1863_v11  ;;  %v1727_v9 = vsub.f32 %v3209_v25, %v3608_v31 }
 0x252   : > { %v2540_v30 = vpop.eup %2539  ;;  %2545 = vrsqrt.f32 %v1660_v60  ;;  %v1534_v22 = vmul.f32 0.00390625, %v1456_v33  ;;  %v1597_v2 = vsub.f32 %v1533_v1, %v1565_v18  ;;  %v1566_v4 = vmul.f32 %v3674_v55, %v3674_v55 }
 0x253   : > { %v1788_v45 = vmul.f32 %v2540_v30, %v1724_v15  ;;  %v1789_v54 = vmul.f32 %v2540_v30, %v1725_v34  ;;  %v1266_v49 = vpop.xlane.xlu1 %1265  ;;  %2002 = vst [vmem:[%s3652_s29 + $0x20] sm:$0xff] %v1938_v37  ;;  %2003 = vst [vmem:[%s3652_s29 + $0x28] sm:$0xff] %v1939_v5  ;;  %v1728_v48 = vsub.f32 %v3224_v40, %v3628_v58 }
 0x254   : > { %v2542_v17 = vpop.eup %2541  ;;  %v3688_v56 = vmul.f32 0.00390625, %v1266_v49  ;;  %v1629_v52 = vmax.f32 %v1597_v2, 0.0  ;;  %v1598_v15 = vsub.f32 %v1534_v22, %v1566_v4  ;;  %v1729_v18 = vsub.f32 %v3227_v44, %v3628_v58 }
 0x255   : > { %v1864_v29 = vmul.f32 %v3618_v24, %v1788_v45  ;;  %v1865_v3 = vmul.f32 %v3626_v21, %v1789_v54  ;;  %v1790_v20 = vmul.f32 %v2542_v17, %v1726_v47  ;;  %v1791_v25 = vmul.f32 %v2542_v17, %v1727_v9  ;;  %v1269_v31 = vpop.xlane.xlu0 %1268 }
 0x256   : > { %v1661_v1 = vadd.f32 1e-12, %v1629_v52  ;;  %v1630_v33 = vmax.f32 %v1598_v15, 0.0  ;;  %v3700_v30 = vmul.f32 0.00390625, %v1269_v31  ;;  %v1567_v5 = vmul.f32 %v3688_v56, %v3688_v56 }
 0x257   : > { %v1940_v7 = vadd.f32 %v3631_v14, %v1864_v29  ;;  %v1941_v26 = vadd.f32 %v3634_v6, %v1865_v3  ;;  %v1866_v11 = vmul.f32 %v3618_v24, %v1790_v20  ;;  %v1867_v60 = vmul.f32 %v3626_v21, %v1791_v25  ;;  %v1459_v34 = vpop.xlane.xlu1 %1458 }
 0x258   : > { %v1535_v22 = vmul.f32 0.00390625, %v1459_v34  ;;  %v1730_v44 = vsub.f32 %v3234_v57, %v3638_v53  ;;  %v1731_v58 = vsub.f32 %v3237_v61, %v3638_v53  ;;  %2547 = vrsqrt.f32 %v1661_v1 }
 0x259   : > { %2004 = vst [vmem:[%s3652_s29 + $0x30] sm:$0xff] %v1940_v7  ;;  %2005 = vst [vmem:[%s3652_s29 + $0x38] sm:$0xff] %v1941_v26  ;;  %v1942_v40 = vadd.f32 %v3631_v14, %v1866_v11  ;;  %v1943_v37 = vadd.f32 %v3634_v6, %v1867_v60  ;;  %v1462_v47 = vpop.xlane.xlu0 %1461  ;;  %v1662_v45 = vadd.f32 1e-12, %v1630_v33  ;;  %v1568_v2 = vmul.f32 %v3700_v30, %v3700_v30 }
 0x25a   : > { %v2544_v9 = vpop.eup %2543  ;;  %v1599_v17 = vsub.f32 %v1535_v22, %v1567_v5  ;;  %v1536_v3 = vmul.f32 0.00390625, %v1462_v47  ;;  %v1732_v47 = vsub.f32 %v3252_v16, %v3662_v28  ;;  %v1735_v16 = vsub.f32 %v3265_v42, %v3674_v55 }
 0x25b   : > { %2006 = vst [vmem:[%s3652_s29 + $0x40] sm:$0xff] %v1942_v40  ;;  %2007 = vst [vmem:[%s3652_s29 + $0x48] sm:$0xff] %v1943_v37  ;;  %v1792_v54 = vmul.f32 %v2544_v9, %v1728_v48  ;;  %v1793_v49 = vmul.f32 %v2544_v9, %v1729_v18  ;;  %v1272_v4 = vpop.xlane.xlu1 %1271  ;;  %2549 = vrsqrt.f32 %v1662_v45 }
 0x25c   : > { %v2546_v29 = vpop.eup %2545  ;;  %v3716_v20 = vmul.f32 0.00390625, %v1272_v4  ;;  %v1631_v48 = vmax.f32 %v1599_v17, 0.0  ;;  %v1600_v52 = vsub.f32 %v1536_v3, %v1568_v2  ;;  %v1734_v2 = vsub.f32 %v3262_v36, %v3674_v55 }
 0x25d   : > { %v1868_v57 = vmul.f32 %v3618_v24, %v1792_v54  ;;  %v1869_v61 = vmul.f32 %v3626_v21, %v1793_v49  ;;  %v1794_v53 = vmul.f32 %v2546_v29, %v1730_v44  ;;  %v1795_v25 = vmul.f32 %v2546_v29, %v1731_v58  ;;  %v1275_v31 = vpop.xlane.xlu0 %1274 }
 0x25e   : > { %v1663_v34 = vadd.f32 1e-12, %v1631_v48  ;;  %v1632_v18 = vmax.f32 %v1600_v52, 0.0  ;;  %v3724_v1 = vmul.f32 0.00390625, %v1275_v31  ;;  %v1569_v37 = vmul.f32 %v3716_v20, %v3716_v20 }
 0x25f   : > { %v1944_v15 = vadd.f32 %v3631_v14, %v1868_v57  ;;  %v1945_v7 = vadd.f32 %v3634_v6, %v1869_v61  ;;  %v1870_v26 = vmul.f32 %v3618_v24, %v1794_v53  ;;  %v1871_v11 = vmul.f32 %v3626_v21, %v1795_v25  ;;  %v1465_v60 = vpop.xlane.xlu1 %1464 }
 0x260   : > { %v1537_v5 = vmul.f32 0.00390625, %v1465_v60  ;;  %2551 = vrsqrt.f32 %v1663_v34  ;;  %v1664_v9 = vadd.f32 1e-12, %v1632_v18  ;;  %v1733_v44 = vsub.f32 %v3255_v23, %v3662_v28 }
 0x261   : > { %2008 = vst [vmem:[%s3652_s29 + $0x50] sm:$0xff] %v1944_v15  ;;  %2009 = vst [vmem:[%s3652_s29 + $0x58] sm:$0xff] %v1945_v7  ;;  %v1946_v33 = vadd.f32 %v3631_v14, %v1870_v26  ;;  %v1947_v40 = vadd.f32 %v3634_v6, %v1871_v11  ;;  %v1468_v22 = vpop.xlane.xlu0 %1467  ;;  %v1570_v45 = vmul.f32 %v3724_v1, %v3724_v1 }
 0x262   : > { %v1601_v58 = vsub.f32 %v1537_v5, %v1569_v37  ;;  %v1538_v54 = vmul.f32 0.00390625, %v1468_v22  ;;  %v2548_v17 = vpop.eup %2547  ;;  %2553 = vrsqrt.f32 %v1664_v9  ;;  %v1736_v55 = vsub.f32 %v3280_v59, %v3688_v56 }
 0x263   : > { %2010 = vst [vmem:[%s3652_s29 + $0x60] sm:$0xff] %v1946_v33  ;;  %2011 = vst [vmem:[%s3652_s29 + $0x68] sm:$0xff] %v1947_v40  ;;  %v1278_v49 = vpop.xlane.xlu1 %1277  ;;  %v1796_v29 = vmul.f32 %v2548_v17, %v1732_v47  ;;  %v1797_v3 = vmul.f32 %v2548_v17, %v1733_v44  ;;  %v1737_v22 = vsub.f32 %v3283_v0, %v3688_v56 }
 0x264   : > { %v3744_v4 = vmul.f32 0.00390625, %v1278_v49  ;;  %v1633_v57 = vmax.f32 %v1601_v58, 0.0  ;;  %v1602_v23 = vsub.f32 %v1538_v54, %v1570_v45  ;;  %v1738_v58 = vsub.f32 %v3290_v19, %v3700_v30 }
 0x265   : > { %v1281_v28 = vpop.xlane.xlu0 %1280  ;;  %v2550_v61 = vpop.eup %2549  ;;  %v1872_v25 = vmul.f32 %v3618_v24, %v1796_v29  ;;  %v1873_v31 = vmul.f32 %v3626_v21, %v1797_v3  ;;  %v1739_v54 = vsub.f32 %v3293_v27, %v3700_v30  ;;  %v1740_v27 = vsub.f32 %v3308_v46, %v3716_v20 }
 0x266   : > { %v3746_v53 = vmul.f32 0.00390625, %v1281_v28  ;;  %v1798_v48 = vmul.f32 %v2550_v61, %v1734_v2  ;;  %v1799_v36 = vmul.f32 %v2550_v61, %v1735_v16  ;;  %v1665_v52 = vadd.f32 1e-12, %v1633_v57 }
 0x267   : > { %v1471_v42 = vpop.xlane.xlu1 %1470  ;;  %v1634_v15 = vmax.f32 %v1602_v23, 0.0  ;;  %v1571_v7 = vmul.f32 %v3744_v4, %v3744_v4  ;;  %v1948_v26 = vadd.f32 %v3631_v14, %v1872_v25  ;;  %v1949_v11 = vadd.f32 %v3634_v6, %v1873_v31 }
 0x268   : > { %v1874_v60 = vmul.f32 %v3618_v24, %v1798_v48  ;;  %v1875_v34 = vmul.f32 %v3626_v21, %v1799_v36  ;;  %2555 = vrsqrt.f32 %v1665_v52  ;;  %v1539_v40 = vmul.f32 0.00390625, %v1471_v42 }
 0x269   : > { %v1474_v18 = vpop.xlane.xlu0 %1473  ;;  %v1666_v33 = vadd.f32 1e-12, %v1634_v15  ;;  %v1572_v59 = vmul.f32 %v3746_v53, %v3746_v53  ;;  %2012 = vst [vmem:[%s3652_s29 + $0x70] sm:$0xff] %v1948_v26  ;;  %2013 = vst [vmem:[%s3652_s29 + $0x78] sm:$0xff] %v1949_v11  ;;  %v1741_v30 = vsub.f32 %v3311_v51, %v3716_v20 }
 0x26a   : > { %v1950_v37 = vadd.f32 %v3631_v14, %v1874_v60  ;;  %v1951_v5 = vadd.f32 %v3634_v6, %v1875_v34  ;;  %v1540_v47 = vmul.f32 0.00390625, %v1474_v18  ;;  %v2552_v44 = vpop.eup %2551  ;;  %v1603_v45 = vsub.f32 %v1539_v40, %v1571_v7 }
 0x26b   : > { %v1284_v9 = vpop.xlane.xlu1 %1283  ;;  %2557 = vrsqrt.f32 %v1666_v33  ;;  %v1800_v49 = vmul.f32 %v2552_v44, %v1736_v55  ;;  %v1801_v17 = vmul.f32 %v2552_v44, %v1737_v22  ;;  %v1742_v18 = vsub.f32 %v3318_v8, %v3724_v1 }
 0x26c   : > { %2014 = vst [vmem:[%s3652_s29 + $0x80] sm:$0xff] %v1950_v37  ;;  %2015 = vst [vmem:[%s3652_s29 + $0x88] sm:$0xff] %v1951_v5  ;;  %v1604_v2 = vsub.f32 %v1540_v47, %v1572_v59  ;;  %v2554_v29 = vpop.eup %2553  ;;  %v1635_v3 = vmax.f32 %v1603_v45, 0.0  ;;  %v3772_v0 = vmul.f32 0.00390625, %v1284_v9  ;;  %v1743_v40 = vsub.f32 %v3321_v13, %v3724_v1 }
 0x26d   : > { %v1287_v16 = vpop.xlane.xlu0 %1286  ;;  %v1876_v57 = vmul.f32 %v3618_v24, %v1800_v49  ;;  %v1877_v19 = vmul.f32 %v3626_v21, %v1801_v17  ;;  %v1802_v23 = vmul.f32 %v2554_v29, %v1738_v58  ;;  %v1803_v28 = vmul.f32 %v2554_v29, %v1739_v54 }
 0x26e   : > { %v3774_v56 = vmul.f32 0.00390625, %v1287_v16  ;;  %v1667_v25 = vadd.f32 1e-12, %v1635_v3  ;;  %v1636_v31 = vmax.f32 %v1604_v2, 0.0  ;;  %v1573_v46 = vmul.f32 %v3772_v0, %v3772_v0 }
 0x26f   : > { %v1477_v61 = vpop.xlane.xlu1 %1476  ;;  %v1952_v48 = vadd.f32 %v3631_v14, %v1876_v57  ;;  %v1953_v36 = vadd.f32 %v3634_v6, %v1877_v19  ;;  %v1878_v42 = vmul.f32 %v3618_v24, %v1802_v23  ;;  %v1879_v55 = vmul.f32 %v3626_v21, %v1803_v28 }
 0x270   : > { %2559 = vrsqrt.f32 %v1667_v25  ;;  %v1668_v15 = vadd.f32 1e-12, %v1636_v31  ;;  %v1541_v7 = vmul.f32 0.00390625, %v1477_v61  ;;  %v1574_v26 = vmul.f32 %v3774_v56, %v3774_v56 }
 0x271   : > { %v1480_v52 = vpop.xlane.xlu0 %1479  ;;  %2016 = vst [vmem:[%s3652_s29 + $0x90] sm:$0xff] %v1952_v48  ;;  %2017 = vst [vmem:[%s3652_s29 + $0x98] sm:$0xff] %v1953_v36  ;;  %v1954_v51 = vadd.f32 %v3631_v14, %v1878_v42  ;;  %v1955_v20 = vadd.f32 %v3634_v6, %v1879_v55  ;;  %v1744_v13 = vsub.f32 %v3336_v35, %v3744_v4 }
 0x272   : > { %v1542_v11 = vmul.f32 0.00390625, %v1480_v52  ;;  %v2556_v34 = vpop.eup %2555  ;;  %2561 = vrsqrt.f32 %v1668_v15  ;;  %v1605_v33 = vsub.f32 %v1541_v7, %v1573_v46  ;;  %v1745_v1 = vsub.f32 %v3339_v43, %v3744_v4 }
 0x273   : > { %v1290_v60 = vpop.xlane.xlu1 %1289  ;;  %2018 = vst [vmem:[%s3652_s29 + $0xa0] sm:$0xff] %v1954_v51  ;;  %2019 = vst [vmem:[%s3652_s29 + $0xa8] sm:$0xff] %v1955_v20  ;;  %v1804_v59 = vmul.f32 %v2556_v34, %v1740_v27  ;;  %v1805_v37 = vmul.f32 %v2556_v34, %v1741_v30  ;;  %v1746_v48 = vsub.f32 %v3346_v62, %v3746_v53 }
 0x274   : > { %v1606_v5 = vsub.f32 %v1542_v11, %v1574_v26  ;;  %v1637_v9 = vmax.f32 %v1605_v33, 0.0  ;;  %v3800_v44 = vmul.f32 0.00390625, %v1290_v60  ;;  %v1747_v42 = vsub.f32 %v3349_v10, %v3746_v53 }
 0x275   : > { %v1293_v22 = vpop.xlane.xlu0 %1292  ;;  %v2558_v47 = vpop.eup %2557  ;;  %v1880_v45 = vmul.f32 %v3618_v24, %v1804_v59  ;;  %v1881_v8 = vmul.f32 %v3626_v21, %v1805_v37  ;;  %v1748_v10 = vsub.f32 %v3364_v32, %v3772_v0  ;;  %v1749_v53 = vsub.f32 %v3367_v41, %v3772_v0 }
 0x276   : > { %v3802_v58 = vmul.f32 0.00390625, %v1293_v22  ;;  %v1806_v54 = vmul.f32 %v2558_v47, %v1742_v18  ;;  %v1807_v49 = vmul.f32 %v2558_v47, %v1743_v40  ;;  %v1669_v2 = vadd.f32 1e-12, %v1637_v9 }
 0x277   : > { %v1483_v17 = vpop.xlane.xlu1 %1482  ;;  %v1638_v16 = vmax.f32 %v1606_v5, 0.0  ;;  %v1956_v29 = vadd.f32 %v3631_v14, %v1880_v45  ;;  %v1957_v3 = vadd.f32 %v3634_v6, %v1881_v8  ;;  %v1575_v35 = vmul.f32 %v3800_v44, %v3800_v44 }
 0x278   : > { %v1882_v57 = vmul.f32 %v3618_v24, %v1806_v54  ;;  %v1883_v19 = vmul.f32 %v3626_v21, %v1807_v49  ;;  %2563 = vrsqrt.f32 %v1669_v2  ;;  %v1543_v61 = vmul.f32 0.00390625, %v1483_v17 }
 0x279   : > { %v1486_v23 = vpop.xlane.xlu0 %1485  ;;  %v1670_v28 = vadd.f32 1e-12, %v1638_v16  ;;  %2020 = vst [vmem:[%s3652_s29 + $0xb0] sm:$0xff] %v1956_v29  ;;  %2021 = vst [vmem:[%s3652_s29 + $0xb8] sm:$0xff] %v1957_v3  ;;  %v1576_v27 = vmul.f32 %v3802_v58, %v3802_v58  ;;  %v1751_v2 = vsub.f32 %v3377_v12, %v3774_v56  ;;  %v1752_v12 = vsub.f32 %v3392_v39, %v3800_v44 }
 0x27a   : > { %v1958_v43 = vadd.f32 %v3631_v14, %v1882_v57  ;;  %v1959_v4 = vadd.f32 %v3634_v6, %v1883_v19  ;;  %v1544_v30 = vmul.f32 0.00390625, %v1486_v23  ;;  %v2560_v31 = vpop.eup %2559  ;;  %v1607_v36 = vsub.f32 %v1543_v61, %v1575_v35 }
 0x27b   : > { %v1296_v25 = vpop.xlane.xlu1 %1295  ;;  %2565 = vrsqrt.f32 %v1670_v28  ;;  %v1808_v55 = vmul.f32 %v2560_v31, %v1744_v13  ;;  %v1809_v52 = vmul.f32 %v2560_v31, %v1745_v1  ;;  %v1750_v13 = vsub.f32 %v3374_v63, %v3774_v56 }
 0x27c   : > { %2022 = vst [vmem:[%s3652_s29 + $0xc0] sm:$0xff] %v1958_v43  ;;  %2023 = vst [vmem:[%s3652_s29 + $0xc8] sm:$0xff] %v1959_v4  ;;  %v1608_v15 = vsub.f32 %v1544_v30, %v1576_v27  ;;  %v2562_v7 = vpop.eup %2561  ;;  %v1639_v51 = vmax.f32 %v1607_v36, 0.0  ;;  %v3828_v20 = vmul.f32 0.00390625, %v1296_v25  ;;  %v1753_v56 = vsub.f32 %v3395_v50, %v3800_v44 }
 0x27d   : > { %v1299_v46 = vpop.xlane.xlu0 %1298  ;;  %v1884_v11 = vmul.f32 %v3618_v24, %v1808_v55  ;;  %v1885_v62 = vmul.f32 %v3626_v21, %v1809_v52  ;;  %v1810_v60 = vmul.f32 %v2562_v7, %v1746_v48  ;;  %v1811_v34 = vmul.f32 %v2562_v7, %v1747_v42 }
 0x27e   : > { %v3830_v26 = vmul.f32 0.00390625, %v1299_v46  ;;  %v1671_v33 = vadd.f32 1e-12, %v1639_v51  ;;  %v1640_v40 = vmax.f32 %v1608_v15, 0.0  ;;  %v1577_v32 = vmul.f32 %v3828_v20, %v3828_v20 }
 0x27f   : > { %v1489_v18 = vpop.xlane.xlu1 %1488  ;;  %v1960_v59 = vadd.f32 %v3631_v14, %v1884_v11  ;;  %v1961_v37 = vadd.f32 %v3634_v6, %v1885_v62  ;;  %v1886_v5 = vmul.f32 %v3618_v24, %v1810_v60  ;;  %v1887_v22 = vmul.f32 %v3626_v21, %v1811_v34  ;;  %v4193_v62 = vld [vmem:[#allocation14_spill] sm:$0xff] }
 0x280   : > { %2567 = vrsqrt.f32 %v1671_v33  ;;  %v1672_v9 = vadd.f32 1e-12, %v1640_v40  ;;  %v1545_v45 = vmul.f32 0.00390625, %v1489_v18  ;;  %v1578_v8 = vmul.f32 %v3830_v26, %v3830_v26  ;;  %v4194_v18 = vld [vmem:[#allocation15_spill] sm:$0xff] }
 0x281   : > { %v1492_v47 = vpop.xlane.xlu0 %1491  ;;  %2024 = vst [vmem:[%s3652_s29 + $0xd0] sm:$0xff] %v1960_v59  ;;  %2025 = vst [vmem:[%s3652_s29 + $0xd8] sm:$0xff] %v1961_v37  ;;  %v1962_v41 = vadd.f32 %v3631_v14, %v1886_v5  ;;  %v1963_v0 = vadd.f32 %v3634_v6, %v1887_v22  ;;  %v1754_v60 = vsub.f32 %v4193_v62, %v3802_v58 }
 0x282   : > { %v1546_v54 = vmul.f32 0.00390625, %v1492_v47  ;;  %v2564_v17 = vpop.eup %2563  ;;  %2569 = vrsqrt.f32 %v1672_v9  ;;  %v1609_v1 = vsub.f32 %v1545_v45, %v1577_v32 }
 0x283   : > { %v1302_v49 = vpop.xlane.xlu1 %1301  ;;  %2026 = vst [vmem:[%s3652_s29 + $0xe0] sm:$0xff] %v1962_v41  ;;  %2027 = vst [vmem:[%s3652_s29 + $0xe8] sm:$0xff] %v1963_v0  ;;  %v1812_v16 = vmul.f32 %v2564_v17, %v1748_v10  ;;  %v1813_v29 = vmul.f32 %v2564_v17, %v1749_v53  ;;  %v1755_v10 = vsub.f32 %v4194_v18, %v3802_v58  ;;  %v4195_v58 = vld [vmem:[#allocation16_spill] sm:$0xff] }
 0x284   : > { %v1610_v3 = vsub.f32 %v1546_v54, %v1578_v8  ;;  %v1641_v23 = vmax.f32 %v1609_v1, 0.0  ;;  %v3856_v28 = vmul.f32 0.00390625, %v1302_v49  ;;  %v1756_v8 = vsub.f32 %v4195_v58, %v3828_v20  ;;  %v4196_v54 = vld [vmem:[#allocation17_spill] sm:$0xff] }
 0x285   : > { %v1305_v57 = vpop.xlane.xlu0 %1304  ;;  %v2566_v19 = vpop.eup %2565  ;;  %v1888_v61 = vmul.f32 %v3618_v24, %v1812_v16  ;;  %v1889_v63 = vmul.f32 %v3626_v21, %v1813_v29  ;;  %v1757_v49 = vsub.f32 %v4196_v54, %v3828_v20  ;;  %v4201_v54 = vld [vmem:[#allocation22_spill] sm:$0xff] }
 0x286   : > { %v3858_v35 = vmul.f32 0.00390625, %v1305_v57  ;;  %v1814_v43 = vmul.f32 %v2566_v19, %v1750_v13  ;;  %v1815_v4 = vmul.f32 %v2566_v19, %v1751_v2  ;;  %v1673_v30 = vadd.f32 1e-12, %v1641_v23 }
 0x287   : > { %v1495_v27 = vpop.xlane.xlu1 %1494  ;;  %v1642_v25 = vmax.f32 %v1610_v3, 0.0  ;;  %v1964_v31 = vadd.f32 %v3631_v14, %v1888_v61  ;;  %v1965_v48 = vadd.f32 %v3634_v6, %v1889_v63  ;;  %v1579_v39 = vmul.f32 %v3856_v28, %v3856_v28 }
 0x288   : > { %v1890_v36 = vmul.f32 %v3618_v24, %v1814_v43  ;;  %v1891_v42 = vmul.f32 %v3626_v21, %v1815_v4  ;;  %2571 = vrsqrt.f32 %v1673_v30  ;;  %v1547_v15 = vmul.f32 0.00390625, %v1495_v27 }
 0x289   : > { %v1498_v55 = vpop.xlane.xlu0 %1497  ;;  %v1674_v52 = vadd.f32 1e-12, %v1642_v25  ;;  %2028 = vst [vmem:[%s3652_s29 + $0xf0] sm:$0xff] %v1964_v31  ;;  %2029 = vst [vmem:[%s3652_s29 + $0xf8] sm:$0xff] %v1965_v48  ;;  %v1580_v46 = vmul.f32 %v3858_v35, %v3858_v35  ;;  %v4198_v25 = vld [vmem:[#allocation19_spill] sm:$0xff] }
 0x28a   : > { %v1966_v50 = vadd.f32 %v3631_v14, %v1890_v36  ;;  %v1967_v44 = vadd.f32 %v3634_v6, %v1891_v42  ;;  %v1548_v7 = vmul.f32 0.00390625, %v1498_v55  ;;  %v2568_v11 = vpop.eup %2567  ;;  %v1611_v34 = vsub.f32 %v1547_v15, %v1579_v39 }
 0x28b   : > { %v1308_v51 = vpop.xlane.xlu1 %1307  ;;  %2573 = vrsqrt.f32 %v1674_v52  ;;  %v1816_v53 = vmul.f32 %v2568_v11, %v1752_v12  ;;  %v1817_v33 = vmul.f32 %v2568_v11, %v1753_v56  ;;  %v4197_v12 = vld [vmem:[#allocation18_spill] sm:$0xff]  ;;  %v1759_v31 = vsub.f32 %v4198_v25, %v3830_v26 }
 0x28c   : > { %2030 = vst [vmem:[%s3652_s29 + $0x100] sm:$0xff] %v1966_v50  ;;  %2031 = vst [vmem:[%s3652_s29 + $0x108] sm:$0xff] %v1967_v44  ;;  %v1612_v40 = vsub.f32 %v1548_v7, %v1580_v46  ;;  %v2570_v37 = vpop.eup %2569  ;;  %v1643_v5 = vmax.f32 %v1611_v34, 0.0  ;;  %v3884_v22 = vmul.f32 0.00390625, %v1308_v51  ;;  %v1758_v56 = vsub.f32 %v4197_v12, %v3830_v26  ;;  %v4199_v26 = vld [vmem:[#allocation20_spill] sm:$0xff] }
 0x28d   : > { %v1311_v59 = vpop.xlane.xlu0 %1310  ;;  %v1892_v9 = vmul.f32 %v3618_v24, %v1816_v53  ;;  %v1893_v32 = vmul.f32 %v3626_v21, %v1817_v33  ;;  %v1818_v45 = vmul.f32 %v2570_v37, %v1754_v60  ;;  %v1819_v41 = vmul.f32 %v2570_v37, %v1755_v10  ;;  %v4200_v60 = vld [vmem:[#allocation21_spill] sm:$0xff] }
 0x28e   : > { %v3886_v47 = vmul.f32 0.00390625, %v1311_v59  ;;  %v1675_v17 = vadd.f32 1e-12, %v1643_v5  ;;  %v1644_v13 = vmax.f32 %v1612_v40, 0.0  ;;  %v1581_v19 = vmul.f32 %v3884_v22, %v3884_v22 }
 0x28f   : > { %v1501_v0 = vpop.xlane.xlu1 %1500  ;;  %v1968_v1 = vadd.f32 %v3631_v14, %v1892_v9  ;;  %v1969_v2 = vadd.f32 %v3634_v6, %v1893_v32  ;;  %v1894_v16 = vmul.f32 %v3618_v24, %v1818_v45  ;;  %v1895_v29 = vmul.f32 %v3626_v21, %v1819_v41 }
 0x290   : > { %2575 = vrsqrt.f32 %v1675_v17  ;;  %v1676_v57 = vadd.f32 1e-12, %v1644_v13  ;;  %v1549_v23 = vmul.f32 0.00390625, %v1501_v0  ;;  %v1582_v63 = vmul.f32 %v3886_v47, %v3886_v47  ;;  %v4202_v13 = vld [vmem:[#allocation23_spill] sm:$0xff] }
 0x291   : > { %v1504_v3 = vpop.xlane.xlu0 %1503  ;;  %2032 = vst [vmem:[%s3652_s29 + $0x110] sm:$0xff] %v1968_v1  ;;  %2033 = vst [vmem:[%s3652_s29 + $0x118] sm:$0xff] %v1969_v2  ;;  %v1970_v20 = vadd.f32 %v3631_v14, %v1894_v16  ;;  %v1971_v61 = vadd.f32 %v3634_v6, %v1895_v29  ;;  %v1760_v62 = vsub.f32 %v4199_v26, %v3856_v28 }
 0x292   : > { %v1550_v43 = vmul.f32 0.00390625, %v1504_v3  ;;  %v2572_v27 = vpop.eup %2571  ;;  %2577 = vrsqrt.f32 %v1676_v57  ;;  %v1613_v30 = vsub.f32 %v1549_v23, %v1581_v19  ;;  %v1761_v34 = vsub.f32 %v4200_v60, %v3856_v28  ;;  %v4205_v60 = vld [vmem:[#allocation26_spill] sm:$0xff] }
 0x293   : > { %v1314_v4 = vpop.xlane.xlu1 %1313  ;;  %2034 = vst [vmem:[%s3652_s29 + $0x120] sm:$0xff] %v1970_v20  ;;  %2035 = vst [vmem:[%s3652_s29 + $0x128] sm:$0xff] %v1971_v61  ;;  %v1820_v48 = vmul.f32 %v2572_v27, %v1756_v8  ;;  %v1821_v36 = vmul.f32 %v2572_v27, %v1757_v49  ;;  %v1762_v49 = vsub.f32 %v4201_v54, %v3858_v35 }
 0x294   : > { %v1614_v42 = vsub.f32 %v1550_v43, %v1582_v63  ;;  %v1645_v39 = vmax.f32 %v1613_v30, 0.0  ;;  %v3912_v15 = vmul.f32 0.00390625, %v1314_v4  ;;  %v1763_v1 = vsub.f32 %v4202_v13, %v3858_v35  ;;  %v4203_v35 = vld [vmem:[#allocation24_spill] sm:$0xff] }
 0x295   : > { %v1317_v55 = vpop.xlane.xlu0 %1316  ;;  %v2574_v52 = vpop.eup %2573  ;;  %v1896_v44 = vmul.f32 %v3618_v24, %v1820_v48  ;;  %v1897_v46 = vmul.f32 %v3626_v21, %v1821_v36  ;;  %v1764_v12 = vsub.f32 %v4203_v35, %v3884_v22 }
 0x296   : > { %v3914_v50 = vmul.f32 0.00390625, %v1317_v55  ;;  %v1822_v7 = vmul.f32 %v2574_v52, %v1758_v56  ;;  %v1823_v51 = vmul.f32 %v2574_v52, %v1759_v31  ;;  %v1677_v18 = vadd.f32 1e-12, %v1645_v39  ;;  %v4204_v56 = vld [vmem:[#allocation25_spill] sm:$0xff] }
 0x297   : > { %v1507_v11 = vpop.xlane.xlu1 %1506  ;;  %v1646_v10 = vmax.f32 %v1614_v42, 0.0  ;;  %v1972_v53 = vadd.f32 %v3631_v14, %v1896_v44  ;;  %v1973_v33 = vadd.f32 %v3634_v6, %v1897_v46  ;;  %v1583_v9 = vmul.f32 %v3912_v15, %v3912_v15 }
 0x298   : > { %v1898_v40 = vmul.f32 %v3618_v24, %v1822_v7  ;;  %v1899_v59 = vmul.f32 %v3626_v21, %v1823_v51  ;;  %2579 = vrsqrt.f32 %v1677_v18  ;;  %v1551_v32 = vmul.f32 0.00390625, %v1507_v11 }
 0x299   : > { %v1510_v37 = vpop.xlane.xlu0 %1509  ;;  %v1678_v5 = vadd.f32 1e-12, %v1646_v10  ;;  %2036 = vst [vmem:[%s3652_s29 + $0x130] sm:$0xff] %v1972_v53  ;;  %2037 = vst [vmem:[%s3652_s29 + $0x138] sm:$0xff] %v1973_v33  ;;  %v1584_v41 = vmul.f32 %v3914_v50, %v3914_v50  ;;  %v1765_v30 = vsub.f32 %v4204_v56, %v3884_v22  ;;  %v4206_v10 = vld [vmem:[#allocation27_spill] sm:$0xff]  ;;  %v4209_v56 = vld [vmem:[#allocation30_spill] sm:$0xff] }
 0x29a   : > { %v1974_v28 = vadd.f32 %v3631_v14, %v1898_v40  ;;  %v1975_v45 = vadd.f32 %v3634_v6, %v1899_v59  ;;  %v1552_v0 = vmul.f32 0.00390625, %v1510_v37  ;;  %v2576_v8 = vpop.eup %2575  ;;  %v1615_v17 = vsub.f32 %v1551_v32, %v1583_v9 }
 0x29b   : > { %v1320_v58 = vpop.xlane.xlu1 %1319  ;;  %2581 = vrsqrt.f32 %v1678_v5  ;;  %v1824_v2 = vmul.f32 %v2576_v8, %v1760_v62  ;;  %v1825_v16 = vmul.f32 %v2576_v8, %v1761_v34  ;;  %v1766_v34 = vsub.f32 %v4205_v60, %v3886_v47 }
 0x29c   : > { %2038 = vst [vmem:[%s3652_s29 + $0x140] sm:$0xff] %v1974_v28  ;;  %2039 = vst [vmem:[%s3652_s29 + $0x148] sm:$0xff] %v1975_v45  ;;  %v1616_v29 = vsub.f32 %v1552_v0, %v1584_v41  ;;  %v2578_v57 = vpop.eup %2577  ;;  %v1647_v19 = vmax.f32 %v1615_v17, 0.0  ;;  %v3940_v23 = vmul.f32 0.00390625, %v1320_v58  ;;  %v1767_v53 = vsub.f32 %v4206_v10, %v3886_v47  ;;  %v4207_v47 = vld [vmem:[#allocation28_spill] sm:$0xff] }
 0x29d   : > { %v1323_v3 = vpop.xlane.xlu0 %1322  ;;  %v1900_v61 = vmul.f32 %v3618_v24, %v1824_v2  ;;  %v1901_v63 = vmul.f32 %v3626_v21, %v1825_v16  ;;  %v1826_v43 = vmul.f32 %v2578_v57, %v1762_v49  ;;  %v1827_v4 = vmul.f32 %v2578_v57, %v1763_v1  ;;  %v4208_v49 = vld [vmem:[#allocation29_spill] sm:$0xff] }
 0x29e   : > { %v3942_v20 = vmul.f32 0.00390625, %v1323_v3  ;;  %v1679_v25 = vadd.f32 1e-12, %v1647_v19  ;;  %v1648_v31 = vmax.f32 %v1616_v29, 0.0  ;;  %v1585_v44 = vmul.f32 %v3940_v23, %v3940_v23 }
 0x29f   : > { %v1513_v27 = vpop.xlane.xlu1 %1512  ;;  %v1976_v48 = vadd.f32 %v3631_v14, %v1900_v61  ;;  %v1977_v36 = vadd.f32 %v3634_v6, %v1901_v63  ;;  %v1902_v42 = vmul.f32 %v3618_v24, %v1826_v43  ;;  %v1903_v55 = vmul.f32 %v3626_v21, %v1827_v4 }
 0x2a0   : > { %2583 = vrsqrt.f32 %v1679_v25  ;;  %v1680_v39 = vadd.f32 1e-12, %v1648_v31  ;;  %v1553_v46 = vmul.f32 0.00390625, %v1513_v27  ;;  %v1586_v51 = vmul.f32 %v3942_v20, %v3942_v20 }
 0x2a1   : > { %v1516_v52 = vpop.xlane.xlu0 %1515  ;;  %2040 = vst [vmem:[%s3652_s29 + $0x150] sm:$0xff] %v1976_v48  ;;  %2041 = vst [vmem:[%s3652_s29 + $0x158] sm:$0xff] %v1977_v36  ;;  %v1978_v22 = vadd.f32 %v3631_v14, %v1902_v42  ;;  %v1979_v7 = vadd.f32 %v3634_v6, %v1903_v55  ;;  %v1768_v54 = vsub.f32 %v4207_v47, %v3912_v15  ;;  %v4210_v48 = vld [vmem:[#allocation31_spill] sm:$0xff] }
 0x2a2   : > { %v1554_v11 = vmul.f32 0.00390625, %v1516_v52  ;;  %v2580_v62 = vpop.eup %2579  ;;  %2585 = vrsqrt.f32 %v1680_v39  ;;  %v1617_v18 = vsub.f32 %v1553_v46, %v1585_v44  ;;  %v1769_v17 = vsub.f32 %v4208_v49, %v3912_v15 }
 0x2a3   : > { %v1326_v26 = vpop.xlane.xlu1 %1325  ;;  %2042 = vst [vmem:[%s3652_s29 + $0x160] sm:$0xff] %v1978_v22  ;;  %2043 = vst [vmem:[%s3652_s29 + $0x168] sm:$0xff] %v1979_v7  ;;  %v1828_v33 = vmul.f32 %v2580_v62, %v1764_v12  ;;  %v1829_v40 = vmul.f32 %v2580_v62, %v1765_v30  ;;  %v1770_v30 = vsub.f32 %v4209_v56, %v3914_v50  ;;  %v4217_v56 = vld [vmem:[#allocation38_spill] sm:$0xff] }
 0x2a4   : > { %v1618_v59 = vsub.f32 %v1554_v11, %v1586_v51  ;;  %v1649_v9 = vmax.f32 %v1617_v18, 0.0  ;;  %v3968_v32 = vmul.f32 0.00390625, %v1326_v26  ;;  %v1771_v36 = vsub.f32 %v4210_v48, %v3914_v50 }
 0x2a5   : > { %v1329_v37 = vpop.xlane.xlu0 %1328  ;;  %v2582_v5 = vpop.eup %2581  ;;  %v1904_v45 = vmul.f32 %v3618_v24, %v1828_v33  ;;  %v1905_v41 = vmul.f32 %v3626_v21, %v1829_v40 }
 0x2a6   : > { %v3970_v28 = vmul.f32 0.00390625, %v1329_v37  ;;  %v1830_v0 = vmul.f32 %v2582_v5, %v1766_v34  ;;  %v1831_v58 = vmul.f32 %v2582_v5, %v1767_v53  ;;  %v1681_v13 = vadd.f32 1e-12, %v1649_v9  ;;  %v4211_v5 = vld [vmem:[#allocation32_spill] sm:$0xff] }
 0x2a7   : > { %v1519_v8 = vpop.xlane.xlu1 %1518  ;;  %v1650_v1 = vmax.f32 %v1618_v59, 0.0  ;;  %v1980_v2 = vadd.f32 %v3631_v14, %v1904_v45  ;;  %v1981_v16 = vadd.f32 %v3634_v6, %v1905_v41  ;;  %v1587_v61 = vmul.f32 %v3968_v32, %v3968_v32  ;;  %v4212_v45 = vld [vmem:[#allocation33_spill] sm:$0xff] }
 0x2a8   : > { %v1906_v29 = vmul.f32 %v3618_v24, %v1830_v0  ;;  %v1907_v3 = vmul.f32 %v3626_v21, %v1831_v58  ;;  %2587 = vrsqrt.f32 %v1681_v13  ;;  %v1555_v63 = vmul.f32 0.00390625, %v1519_v8  ;;  %v4213_v8 = vld [vmem:[#allocation34_spill] sm:$0xff] }
 0x2a9   : > { %v1522_v57 = vpop.xlane.xlu0 %1521  ;;  %v1682_v19 = vadd.f32 1e-12, %v1650_v1  ;;  %2044 = vst [vmem:[%s3652_s29 + $0x170] sm:$0xff] %v1980_v2  ;;  %2045 = vst [vmem:[%s3652_s29 + $0x178] sm:$0xff] %v1981_v16  ;;  %v1588_v4 = vmul.f32 %v3970_v28, %v3970_v28  ;;  %v1772_v9 = vsub.f32 %v4211_v5, %v3940_v23  ;;  %v1773_v41 = vsub.f32 %v4212_v45, %v3940_v23 }
 0x2aa   : > { %v1982_v15 = vadd.f32 %v3631_v14, %v1906_v29  ;;  %v1983_v43 = vadd.f32 %v3634_v6, %v1907_v3  ;;  %v1556_v27 = vmul.f32 0.00390625, %v1522_v57  ;;  %v2584_v12 = vpop.eup %2583  ;;  %v1619_v25 = vsub.f32 %v1555_v63, %v1587_v61  ;;  %v4214_v63 = vld [vmem:[#allocation35_spill] sm:$0xff] }
 0x2ab   : > { %v1332_v35 = vpop.xlane.xlu1 %1331  ;;  %2589 = vrsqrt.f32 %v1682_v19  ;;  %v1832_v42 = vmul.f32 %v2584_v12, %v1768_v54  ;;  %v1833_v55 = vmul.f32 %v2584_v12, %v1769_v17  ;;  %v1774_v47 = vsub.f32 %v4213_v8, %v3942_v20 }
 0x2ac   : > { %v3992_v31 = vmul.f32 0.00390625, %v1332_v35  ;;  %2046 = vst [vmem:[%s3652_s29 + $0x180] sm:$0xff] %v1982_v15  ;;  %2047 = vst [vmem:[%s3652_s29 + $0x188] sm:$0xff] %v1983_v43  ;;  %v1620_v52 = vsub.f32 %v1556_v27, %v1588_v4  ;;  %v2586_v39 = vpop.eup %2585  ;;  %v1651_v44 = vmax.f32 %v1619_v25, 0.0  ;;  %v1775_v54 = vsub.f32 %v3545_v38, %v3942_v20  ;;  %v4215_v43 = vld [vmem:[#allocation36_spill] sm:$0xff]  ;;  %v4216_v35 = vld [vmem:[#allocation37_spill] sm:$0xff] }
 0x2ad   : > { %v1908_v46 = vmul.f32 %v3618_v24, %v1832_v42  ;;  %v1909_v22 = vmul.f32 %v3626_v21, %v1833_v55  ;;  %v1834_v7 = vmul.f32 %v2586_v39, %v1770_v30  ;;  %v1835_v51 = vmul.f32 %v2586_v39, %v1771_v36  ;;  %v4218_v39 = vld [vmem:[#allocation39_spill] sm:$0xff] }
 0x2ae   : > { %v1683_v26 = vadd.f32 1e-12, %v1651_v44  ;;  %v1652_v62 = vmax.f32 %v1620_v52, 0.0  ;;  %v1589_v60 = vmul.f32 %v3992_v31, %v3992_v31  ;;  %v1776_v15 = vsub.f32 %v4214_v63, %v3968_v32 }
 0x2af   : > { %v1525_v11 = vpop.xlane.xlu1 %1524  ;;  %v1984_v34 = vadd.f32 %v3631_v14, %v1908_v46  ;;  %v1985_v18 = vadd.f32 %v3634_v6, %v1909_v22  ;;  %v1910_v10 = vmul.f32 %v3618_v24, %v1834_v7  ;;  %v1911_v53 = vmul.f32 %v3626_v21, %v1835_v51  ;;  %v4219_v46 = vld [vmem:[#allocation40_spill] sm:$0xff] }
 0x2b0   : > { %v1557_v50 = vmul.f32 0.00390625, %v1525_v11  ;;  %2591 = vrsqrt.f32 %v1683_v26  ;;  %v1684_v33 = vadd.f32 1e-12, %v1652_v62  ;;  %v1777_v4 = vsub.f32 %v4215_v43, %v3968_v32 }
 0x2b1   : > { %2048 = vst [vmem:[%s3652_s29 + $0x190] sm:$0xff] %v1984_v34  ;;  %2049 = vst [vmem:[%s3652_s29 + $0x198] sm:$0xff] %v1985_v18  ;;  %v1986_v59 = vadd.f32 %v3631_v14, %v1910_v10  ;;  %v1987_v37 = vadd.f32 %v3634_v6, %v1911_v53  ;;  %v1778_v12 = vsub.f32 %v4216_v35, %v3970_v28 }
 0x2b2   : > { %v1621_v40 = vsub.f32 %v1557_v50, %v1589_v60  ;;  %v2588_v0 = vpop.eup %2587  ;;  %2593 = vrsqrt.f32 %v1684_v33  ;;  %v1779_v30 = vsub.f32 %v4217_v56, %v3970_v28  ;;  %v1780_v44 = vsub.f32 %v4218_v39, %v3992_v31 }
 0x2b3   : > { %2050 = vst [vmem:[%s3652_s29 + $0x1a0] sm:$0xff] %v1986_v59  ;;  %2051 = vst [vmem:[%s3652_s29 + $0x1a8] sm:$0xff] %v1987_v37  ;;  %v1836_v49 = vmul.f32 %v2588_v0, %v1772_v9  ;;  %v1837_v17 = vmul.f32 %v2588_v0, %v1773_v41  ;;  %v1781_v28 = vsub.f32 %v4219_v46, %v3992_v31 }
 0x2b4   : > { %v1653_v58 = vmax.f32 %v1621_v40, 0.0 }
 0x2b5   : > { %v2590_v13 = vpop.eup %2589  ;;  %v1912_v2 = vmul.f32 %v3618_v24, %v1836_v49  ;;  %v1913_v23 = vmul.f32 %v3626_v21, %v1837_v17 }
 0x2b6   : > { %v1685_v1 = vadd.f32 1e-12, %v1653_v58  ;;  %v1838_v16 = vmul.f32 %v2590_v13, %v1774_v47  ;;  %v1839_v29 = vmul.f32 %v2590_v13, %v1775_v54 }
 0x2b7   : > { %v1988_v3 = vadd.f32 %v3631_v14, %v1912_v2  ;;  %v1989_v57 = vadd.f32 %v3634_v6, %v1913_v23 }
 0x2b8   : > { %2595 = vrsqrt.f32 %v1685_v1  ;;  %v1914_v19 = vmul.f32 %v3618_v24, %v1838_v16  ;;  %v1915_v38 = vmul.f32 %v3626_v21, %v1839_v29 }
 0x2b9   : > { %2052 = vst [vmem:[%s3652_s29 + $0x1b0] sm:$0xff] %v1988_v3  ;;  %2053 = vst [vmem:[%s3652_s29 + $0x1b8] sm:$0xff] %v1989_v57 }
 0x2ba   : > { %v1990_v20 = vadd.f32 %v3631_v14, %v1914_v19  ;;  %v1991_v61 = vadd.f32 %v3634_v6, %v1915_v38  ;;  %v2592_v27 = vpop.eup %2591 }
 0x2bb   : > { %v1840_v25 = vmul.f32 %v2592_v27, %v1776_v15  ;;  %v1841_v48 = vmul.f32 %v2592_v27, %v1777_v4 }
 0x2bc   : > { %2054 = vst [vmem:[%s3652_s29 + $0x1c0] sm:$0xff] %v1990_v20  ;;  %2055 = vst [vmem:[%s3652_s29 + $0x1c8] sm:$0xff] %v1991_v61  ;;  %v2594_v36 = vpop.eup %2593 }
 0x2bd   : > { %v1916_v42 = vmul.f32 %v3618_v24, %v1840_v25  ;;  %v1917_v55 = vmul.f32 %v3626_v21, %v1841_v48  ;;  %v1842_v32 = vmul.f32 %v2594_v36, %v1778_v12  ;;  %v1843_v52 = vmul.f32 %v2594_v36, %v1779_v30 }
 0x2bf   : > { %v1992_v22 = vadd.f32 %v3631_v14, %v1916_v42  ;;  %v1993_v7 = vadd.f32 %v3634_v6, %v1917_v55  ;;  %v1918_v51 = vmul.f32 %v3618_v24, %v1842_v32  ;;  %v1919_v11 = vmul.f32 %v3626_v21, %v1843_v52 }
 0x2c1   : > { %2056 = vst [vmem:[%s3652_s29 + $0x1d0] sm:$0xff] %v1992_v22  ;;  %2057 = vst [vmem:[%s3652_s29 + $0x1d8] sm:$0xff] %v1993_v7  ;;  %v1994_v62 = vadd.f32 %v3631_v14, %v1918_v51  ;;  %v1995_v60 = vadd.f32 %v3634_v6, %v1919_v11 }
 0x2c2   : > { %v2596_v26 = vpop.eup %2595 }
 0x2c3   : > { %v1844_v50 = vmul.f32 %v2596_v26, %v1780_v44  ;;  %v1845_v31 = vmul.f32 %v2596_v26, %v1781_v28  ;;  %2058 = vst [vmem:[%s3652_s29 + $0x1e0] sm:$0xff] %v1994_v62  ;;  %2059 = vst [vmem:[%s3652_s29 + $0x1e8] sm:$0xff] %v1995_v60 }
 0x2c5   : > { %v1920_v34 = vmul.f32 %v3618_v24, %v1844_v50  ;;  %v1921_v18 = vmul.f32 %v3626_v21, %v1845_v31 }
 0x2c7   : > { %v1996_v10 = vadd.f32 %v3631_v14, %v1920_v34  ;;  %v1997_v53 = vadd.f32 %v3634_v6, %v1921_v18 }
 0x2c9   : > { %2060 = vst [vmem:[%s3652_s29 + $0x1f0] sm:$0xff] %v1996_v10  ;;  %2061 = vst [vmem:[%s3652_s29 + $0x1f8] sm:$0xff] %v1997_v53 }
 0x2ca   : > { %2698 = shalt.err (!%p2695_p4)
}
 0x2cb   : > { %s2699_s27 = scalar_lea.hbm %s4063_s17, 8192  ;;  %s2703_s28 = scalar_lea.hbm %s4119_s6, 16384 }
 0x2cc   : > { %p2700_p11 = scmp.ne.s32.totalorder %s4063_s17, %s2699_s27  ;;  %p2704_p5 = scmp.lt.u32.totalorder %s4063_s17, %s4119_s6 }
 0x2cd   : > { %p2705_p0 = scmp.lt.u32.totalorder %s2703_s28, %s2699_s27  ;;  %p2707_p9 = scmp.lt.u32.totalorder %s2699_s27, %s4063_s17 }
 0x2ce   : > { %p2701_p10 = pnand %p2700_p11, %p4220_p12 }
 0x2cf   : > { %p2706_p7 = por %p2705_p0, %p2704_p5 }
 0x2d0   : > { %p2702_p8 = pneg %p2701_p10 }
 0x2d1   : > { %p2708_p2 = por %p2707_p9, %p2706_p7 }
 0x2d3   : > { %p2709_p6 = pnand %p2708_p2, %p2702_p8 }
 0x2d5   : > { %2712 = shalt.err (!%p2709_p6)
}
 0x2d6   : > { %s2769_s8 = smov 256   ;;  %s2770_s29 = smov 16  }
 0x2d7   : > { %2473 = dma.vmem_to_hbm [thread:$0]  (%p4220_p12), %s4065_s14, 8192, %s4063_s17, %s2063_s18, %s2769_s8, %s2769_s8, %s2770_s29  }
 0x2d8 PF: > { %s2092_s9 = sand.u32 1, %s2747_s21   ;;  %p4221_p13 = scmp.ne.s32.totalorder %s4158_s13, 0 }
 0x2d9   : > { %p4222_p3 = scmp.ge.s32.totalorder %s2759_s24, 2  ;;  %s2093_s3 = scalar_lea.sflag [#allocation4], %s2092_s9 }
 0x2db   : > { %p2487_p1 = pnand %p4222_p3, %p4221_p13 }
 0x2dd   : > { %2742 = dma.done.wait (!%p2487_p1), %s2093_s3, 8192  }
 0x2de   : > { %2744 = vsyncadd (!%p2487_p1), %s2093_s3, 4294959104  ;;  %s4223_s15 = sld [smem:[#allocation13_spill]]  ;;  %p20_p4 = scmp.ge.s32.totalorder %s2827_s25, 4  }
 0x2df   : > { %s4224_s21 = smov %s2751_s22  ;;  %s4225_s22 = smov %s2755_s23 }
 0x2e0   : > { %s4227_s24 = smov %s2827_s25  ;;  %22 = sbr.rel (!%p20_p4) target bundleno = 9 (0x9), region = 104 }
 0x2e4   : > { %s4226_s23 = smov %s4223_s15 }
 0x2e7   :  { %2098 = vsyncpa [#allocation3], 1 }
 0x2e8   :  { %2100 = vsyncpa [#allocation3 + $0x1], 1 }
 0x2e9   :  { %2101 = vsyncpa [#allocation6], 1 }
 0x2ea   :  { %2102 = vsyncpa [#allocation4], 1 }
 0x2eb   :  { %2104 = vsyncpa [#allocation4 + $0x1], 1 }

</bundles_post_ra>
